<compile_context>
chip_gen: v7x
topology: tpu7x:2x2x1
jax: 0.10.0
libtpu: 0.0.40
codegen_flags: <defaults>
</compile_context>

<pallas_src>
import math
import functools
import numpy as np
import jax
import jax.numpy as jnp
from jax.experimental import pallas as pl
from jax.experimental.pallas import tpu as pltpu

_EPS = 1e-5  # torch.nn.LayerNorm default eps


def _matT(a, w):
    """a @ w.T with fp32 accumulation: a (M, K), w (N, K) -> (M, N)."""
    return jax.lax.dot_general(
        a, w, (((1,), (1,)), ((), ())), preferred_element_type=jnp.float32)


def _layernorm(x, g, b):
    m = jnp.mean(x, axis=-1, keepdims=True)
    v = jnp.mean(jnp.square(x - m), axis=-1, keepdims=True)
    return (x - m) * jax.lax.rsqrt(v + _EPS) * g + b


def _bf16(x):
    return x.astype(jnp.bfloat16)


# ----------------------------------------------------------------------------
# Kernel 1: T-chunked adaptive average pool + relative-position MHA
#   grid = (B, T chunks);  pooled (L, C) sum accumulated in VMEM scratch,
#   attention runs only on the last chunk.
# ----------------------------------------------------------------------------
def _pool_mha_kernel(x_ref, p_ref, pos_ref, g_ref, b_ref,
                     wq_ref, bq_ref, wk_ref, bk_ref, wv_ref, bv_ref,
                     wo_ref, bo_ref, ls_ref, o_ref, acc_ref,
                     *, n_head, d_k, T, tTp, mask_tail):
    t = pl.program_id(1)

    @pl.when(t == 0)
    def _():
        acc_ref[...] = jnp.zeros_like(acc_ref)

    # partial adaptive-average-pool of this time chunk: (L, tTp) . (C, tTp)^T
    x_c = _bf16(x_ref[0])                                   # (C, tTp)
    p_c = p_ref[...]                                        # (L, tTp) bf16
    if mask_tail:
        # partial tail chunk: zero columns beyond T so undefined padding (x)
        # cannot poison the pooled sum (P is host-padded with zeros already).
        col = t * tTp + jax.lax.broadcasted_iota(jnp.int32, x_c.shape, 1)
        x_c = jnp.where(col < T, x_c, 0)
    acc_ref[...] += _matT(p_c, x_c)                         # (L, C) f32

    @pl.when(t == pl.num_programs(1) - 1)
    def _():
        xd = acc_ref[...]                                   # pooled (L, C) f32
        xn = _layernorm(xd, g_ref[...], b_ref[...])
        xb = _bf16(xn)

        inv_sqrt_dk = 1.0 / math.sqrt(d_k)
        # fold 1/sqrt(d_k) into q (scores are linear in q)
        q = (_matT(xb, wq_ref[...]) + bq_ref[...]) * inv_sqrt_dk   # (L, C) f32
        k = _matT(xb, wk_ref[...]) + bk_ref[...]
        v = _matT(xb, wv_ref[...]) + bv_ref[...]
        qb, kb, vb = _bf16(q), _bf16(k), _bf16(v)

        def split_heads(a):                                  # (L, C) -> (H, L, d_k)
            return jnp.stack(
                [a[:, h * d_k:(h + 1) * d_k] for h in range(n_head)], axis=0)

        q_h, k_h, v_h = split_heads(qb), split_heads(kb), split_heads(vb)

        # content scores for ALL heads in one H-batched MXU matmul: (H, L, L)
        content = jax.lax.dot_general(
            q_h, k_h, (((2,), (2,)), ((0,), (0,))),
            preferred_element_type=jnp.float32)
        # relative-position scores, batched over the query position l: (L, H, L)
        brel = jax.lax.dot_general(
            q_h, pos_ref[...], (((2,), (2,)), ((1,), (0,))),
            preferred_element_type=jnp.float32)
        # re-layout (L, H, L) -> (H, L, L) via static per-head slices (tiny)
        brel = jnp.stack([brel[:, h, :] for h in range(n_head)], axis=0)

        s = content + brel                                   # (H, L, L) f32
        m = jnp.max(s, axis=-1, keepdims=True)
        e = jnp.exp(s - m)
        p_attn = e * pl.reciprocal(jnp.sum(e, axis=-1, keepdims=True),
                                   approx=True)

        # context for ALL heads in one H-batched MXU matmul: (H, L, d_k)
        ctx = jax.lax.dot_general(
            _bf16(p_attn), v_h, (((2,), (1,)), ((0,), (0,))),
            preferred_element_type=jnp.float32)
        # concat heads back to (L, C) and run ONE K=C output projection
        ctx_lc = jnp.concatenate([ctx[h] for h in range(n_head)], axis=-1)
        out = (_matT(_bf16(ctx_lc), wo_ref[...]) + bo_ref[...]) * ls_ref[...]
        o_ref[0] = out.astype(o_ref.dtype)


# ----------------------------------------------------------------------------
# Kernel 2: nearest upsample + sigmoid gate + residual, native (B, C, T) input
#   per-tile in-kernel transpose; upsample selector built from iota (no U).
# ----------------------------------------------------------------------------
def _gate_kernel(x_ref, xa_ref, g_ref, b_ref, w_ref, bw_ref, o_ref,
                 *, T, L, tT):
    t0 = pl.program_id(1) * tT
    x = x_ref[0].T                                          # (C, tT) -> (tT, C)
    xn = _layernorm(x, g_ref[...], b_ref[...])
    gate = jax.nn.sigmoid(_matT(_bf16(xn), w_ref[...]) + bw_ref[...])

    # nearest-neighbour upsample of the attended block for this time tile:
    #   out[t] = xa[floor(t * L / T)], built as a one-hot selector in-register
    rows = t0 + jax.lax.broadcasted_iota(jnp.int32, (tT, L), 0)
    cols = jax.lax.broadcasted_iota(jnp.int32, (tT, L), 1)
    sel = ((rows * L) // T == cols).astype(jnp.float32)      # (tT, L)
    xdu = jnp.dot(sel, xa_ref[0], preferred_element_type=jnp.float32)  # (tT, C)

    o_ref[0] = (x + gate * xdu).astype(o_ref.dtype)


# ----------------------------------------------------------------------------
# Pool / upsample index matrices (match PyTorch semantics)
# ----------------------------------------------------------------------------
def _pool_upsample_mats(T, L):
    # adaptive_avg_pool1d: window i = [floor(i*T/L), ceil((i+1)*T/L))
    P = np.zeros((L, T), np.float32)
    for i in range(L):
        s = (i * T) // L
        e = -((-(i + 1) * T) // L)
        P[i, s:e] = 1.0 / (e - s)
    # F.upsample (nearest): out[t] = in[floor(t * L / T)]   (reference only)
    U = np.zeros((T, L), np.float32)
    idx = (np.arange(T) * L) // T
    U[np.arange(T), idx] = 1.0
    return P, U


def _choose_time_chunk(T, max_chunk):
    """Time chunk for a (.., C, T) input block: multiple of 128 (lane dim) or
    the whole T."""
    if T <= max_chunk:
        return T
    t = (max_chunk // 128) * 128
    while t >= 128:
        if T % t == 0:
            return t
        t -= 128
    # no 128-aligned divisor: fixed tile with a masked / partial tail block
    return (max_chunk // 128) * 128


# ----------------------------------------------------------------------------
# EGA forward
# ----------------------------------------------------------------------------
def ega_forward(x, pos_k, params):
    B, C, T = x.shape
    L, _, d_k = pos_k.shape
    n_head = params["n_head"]
    assert C == n_head * d_k

    pos_b = pos_k.astype(jnp.bfloat16)
    bf = lambda a: a.astype(jnp.bfloat16)

    # ---- kernel 1: T-chunked pool + relative-position MHA ----
    tTp = _choose_time_chunk(T, 2048)
    nTp = pl.cdiv(T, tTp)
    T_pad = nTp * tTp
    mask_tail = (T_pad != T)

    P_np, _ = _pool_upsample_mats(T, L)
    if mask_tail:
        P_np = np.pad(P_np, ((0, 0), (0, T_pad - T)))       # zero padded columns
    P = jnp.asarray(P_np, jnp.bfloat16)

    x_attn = pl.pallas_call(
        functools.partial(_pool_mha_kernel, n_head=n_head, d_k=d_k,
                          T=T, tTp=tTp, mask_tail=mask_tail),
        out_shape=jax.ShapeDtypeStruct((B, L, C), jnp.float32),
        grid=(B, nTp),
        in_specs=[
            pl.BlockSpec((1, C, tTp), lambda b, t: (b, 0, t)),   # x, native layout
            pl.BlockSpec((L, tTp), lambda b, t: (0, t)),         # pool matrix chunk
            pl.BlockSpec((L, L, d_k), lambda b, t: (0, 0, 0)),   # pos_k
            pl.BlockSpec((1, C), lambda b, t: (0, 0)),           # ln1 gamma
            pl.BlockSpec((1, C), lambda b, t: (0, 0)),           # ln1 beta
            pl.BlockSpec((C, C), lambda b, t: (0, 0)),           # Wq
            pl.BlockSpec((1, C), lambda b, t: (0, 0)),           # bq
            pl.BlockSpec((C, C), lambda b, t: (0, 0)),           # Wk
            pl.BlockSpec((1, C), lambda b, t: (0, 0)),           # bk
            pl.BlockSpec((C, C), lambda b, t: (0, 0)),           # Wv
            pl.BlockSpec((1, C), lambda b, t: (0, 0)),           # bv
            pl.BlockSpec((C, C), lambda b, t: (0, 0)),           # Wo
            pl.BlockSpec((1, C), lambda b, t: (0, 0)),           # bo
            pl.BlockSpec((1, C), lambda b, t: (0, 0)),           # layer_scale
        ],
        out_specs=pl.BlockSpec((1, L, C), lambda b, t: (b, 0, 0)),
        scratch_shapes=[pltpu.VMEM((L, C), jnp.float32)],
        compiler_params=pltpu.CompilerParams(
            dimension_semantics=("parallel", "arbitrary")),
    )(x, P, pos_b, params["ln1_g"], params["ln1_b"],
      bf(params["wq"]), params["bq"], bf(params["wk"]), params["bk"],
      bf(params["wv"]), params["bv"], bf(params["wo"]), params["bo"],
      params["layer_scale"])

    # ---- kernel 2: upsample + sigmoid gate + residual, native layout, T-tiled ----
    tT = _choose_time_chunk(T, 1024)
    nT = pl.cdiv(T, tT)
    out = pl.pallas_call(
        functools.partial(_gate_kernel, T=T, L=L, tT=tT),
        out_shape=jax.ShapeDtypeStruct((B, T, C), jnp.float32),
        grid=(B, nT),
        in_specs=[
            pl.BlockSpec((1, C, tT), lambda b, t: (b, 0, t)),    # x, native (B,C,T)
            pl.BlockSpec((1, L, C), lambda b, t: (b, 0, 0)),     # attended block
            pl.BlockSpec((1, C), lambda b, t: (0, 0)),           # ln2 gamma
            pl.BlockSpec((1, C), lambda b, t: (0, 0)),           # ln2 beta
            pl.BlockSpec((C, C), lambda b, t: (0, 0)),           # gate W
            pl.BlockSpec((1, C), lambda b, t: (0, 0)),           # gate b
        ],
        out_specs=pl.BlockSpec((1, tT, C), lambda b, t: (b, t, 0)),
        compiler_params=pltpu.CompilerParams(
            dimension_semantics=("parallel", "parallel")),
    )(x, x_attn, params["ln2_g"], params["ln2_b"],
      bf(params["wg"]), params["bg"])
    return out


# ----------------------------------------------------------------------------
# Deterministic parameter construction (shapes from the module __init__)
# ----------------------------------------------------------------------------
def make_params(key, C, n_head):
    ks = jax.random.split(key, 5)
    s = 1.0 / math.sqrt(C)

    def lin(k):
        kw, kb = jax.random.split(k)
        w = jax.random.uniform(kw, (C, C), jnp.float32, -s, s)
        b = jax.random.uniform(kb, (1, C), jnp.float32, -s, s)
        return w, b

    wq, bq = lin(ks[0]); wk, bk = lin(ks[1]); wv, bv = lin(ks[2])
    wo, bo = lin(ks[3]); wg, bg = lin(ks[4])
    return dict(
        n_head=n_head,
        ln1_g=jnp.ones((1, C), jnp.float32), ln1_b=jnp.zeros((1, C), jnp.float32),
        wq=wq, bq=bq, wk=wk, bk=bk, wv=wv, bv=bv, wo=wo, bo=bo,
        layer_scale=jnp.full((1, C), 1e-5, jnp.float32),
        ln2_g=jnp.ones((1, C), jnp.float32), ln2_b=jnp.zeros((1, C), jnp.float32),
        wg=wg, bg=bg,
    )


# ----------------------------------------------------------------------------
# Pure-JAX reference (mirrors the PyTorch forward), for a correctness check
# ----------------------------------------------------------------------------
def ega_reference(x, pos_k, params):
    B, C, T = x.shape
    L, _, d_k = pos_k.shape
    n_head = params["n_head"]
    P_np, U_np = _pool_upsample_mats(T, L)
    P = jnp.asarray(P_np, jnp.float32)
    U = jnp.asarray(U_np, jnp.float32)
    hi = jax.lax.Precision.HIGHEST

    x_btc = jnp.transpose(x, (0, 2, 1))
    x_down = jnp.einsum("lt,btc->blc", P, x_btc, precision=hi)

    def ln(z, g, b):
        m = jnp.mean(z, -1, keepdims=True)
        v = jnp.mean((z - m) ** 2, -1, keepdims=True)
        return (z - m) / jnp.sqrt(v + _EPS) * g + b

    xn = ln(x_down, params["ln1_g"], params["ln1_b"])
    q = jnp.einsum("blc,dc->bld", xn, params["wq"], precision=hi) + params["bq"]
    k = jnp.einsum("blc,dc->bld", xn, params["wk"], precision=hi) + params["bk"]
    v = jnp.einsum("blc,dc->bld", xn, params["wv"], precision=hi) + params["bv"]
    q = q.reshape(B, L, n_head, d_k).transpose(0, 2, 1, 3)
    k = k.reshape(B, L, n_head, d_k).transpose(0, 2, 1, 3)
    v = v.reshape(B, L, n_head, d_k).transpose(0, 2, 1, 3)
    A = jnp.einsum("bhld,bhmd->bhlm", q, k, precision=hi)
    Brel = jnp.einsum("bhld,lmd->bhlm", q, pos_k, precision=hi)
    attn = jax.nn.softmax((A + Brel) / math.sqrt(d_k), axis=-1)
    o = jnp.einsum("bhlm,bhmd->bhld", attn, v, precision=hi)
    o = o.transpose(0, 2, 1, 3).reshape(B, L, C)
    o = (jnp.einsum("blc,dc->bld", o, params["wo"], precision=hi)
         + params["bo"]) * params["layer_scale"]
    x_downup = jnp.einsum("tl,blc->btc", U, o, precision=hi)
    gate = jax.nn.sigmoid(
        jnp.einsum("btc,dc->btd", ln(x_btc, params["ln2_g"], params["ln2_b"]),
                   params["wg"], precision=hi) + params["bg"])
    return x_btc + gate * x_downup


if __name__ == "__main__":
    B, C, T = 2, 32, 16          # batch, channels, time
    H = 4                        # num_mha_heads
    L = 8                        # down_len = pos_k.shape[0]
    d_k = C // H

    key = jax.random.PRNGKey(0)
    kx, kp, kw = jax.random.split(key, 3)
    x = jax.random.normal(kx, (B, C, T), jnp.float32)
    pos_k = 0.1 * jax.random.normal(kp, (L, L, d_k), jnp.float32)
    params = make_params(kw, C, H)

    out = ega_forward(x, pos_k, params)
    out = jax.block_until_ready(out)

    ref = jax.block_until_ready(ega_reference(x, pos_k, params))
    np.testing.assert_allclose(np.asarray(out), np.asarray(ref),
                               rtol=1e-2, atol=1e-3)
    print("KERNEL_OK")
</pallas_src>

<mosaic_0001>
module attributes {stable_mosaic.version = 11 : i64} {
  func.func @_pool_mha_kernel(%arg0: i32, %arg1: i32, %arg2: memref<1x32x16xf32, #tpu.memory_space<vmem>>, %arg3: memref<8x16xbf16, #tpu.memory_space<vmem>>, %arg4: memref<8x8x8xbf16, #tpu.memory_space<vmem>>, %arg5: memref<1x32xf32, #tpu.memory_space<vmem>>, %arg6: memref<1x32xf32, #tpu.memory_space<vmem>>, %arg7: memref<32x32xbf16, #tpu.memory_space<vmem>>, %arg8: memref<1x32xf32, #tpu.memory_space<vmem>>, %arg9: memref<32x32xbf16, #tpu.memory_space<vmem>>, %arg10: memref<1x32xf32, #tpu.memory_space<vmem>>, %arg11: memref<32x32xbf16, #tpu.memory_space<vmem>>, %arg12: memref<1x32xf32, #tpu.memory_space<vmem>>, %arg13: memref<32x32xbf16, #tpu.memory_space<vmem>>, %arg14: memref<1x32xf32, #tpu.memory_space<vmem>>, %arg15: memref<1x32xf32, #tpu.memory_space<vmem>>, %arg16: memref<1x8x32xf32, #tpu.memory_space<vmem>>, %arg17: memref<8x32xf32, #tpu.memory_space<vmem>>) attributes {dimension_semantics = [#tpu.dimension_semantics<parallel>, #tpu.dimension_semantics<arbitrary>], iteration_bounds = array<i64: 2, 1>, scalar_prefetch = 0 : i64, scratch_operands = 1 : i64, tpu.core_type = #tpu.core_type<tc>, window_params = [{transform_indices = @transform_0, window_bounds = array<i64: 1, 32, 16>}, {transform_indices = @transform_1, window_bounds = array<i64: 8, 16>}, {pipeline_mode = #tpu.pipeline_mode<synchronous>, transform_indices = @transform_2, window_bounds = array<i64: 8, 8, 8>}, {pipeline_mode = #tpu.pipeline_mode<synchronous>, transform_indices = @transform_3, window_bounds = array<i64: 1, 32>}, {pipeline_mode = #tpu.pipeline_mode<synchronous>, transform_indices = @transform_4, window_bounds = array<i64: 1, 32>}, {pipeline_mode = #tpu.pipeline_mode<synchronous>, transform_indices = @transform_5, window_bounds = array<i64: 32, 32>}, {pipeline_mode = #tpu.pipeline_mode<synchronous>, transform_indices = @transform_6, window_bounds = array<i64: 1, 32>}, {pipeline_mode = #tpu.pipeline_mode<synchronous>, transform_indices = @transform_7, window_bounds = array<i64: 32, 32>}, {pipeline_mode = #tpu.pipeline_mode<synchronous>, transform_indices = @transform_8, window_bounds = array<i64: 1, 32>}, {pipeline_mode = #tpu.pipeline_mode<synchronous>, transform_indices = @transform_9, window_bounds = array<i64: 32, 32>}, {pipeline_mode = #tpu.pipeline_mode<synchronous>, transform_indices = @transform_10, window_bounds = array<i64: 1, 32>}, {pipeline_mode = #tpu.pipeline_mode<synchronous>, transform_indices = @transform_11, window_bounds = array<i64: 32, 32>}, {pipeline_mode = #tpu.pipeline_mode<synchronous>, transform_indices = @transform_12, window_bounds = array<i64: 1, 32>}, {pipeline_mode = #tpu.pipeline_mode<synchronous>, transform_indices = @transform_13, window_bounds = array<i64: 1, 32>}, {transform_indices = @transform_14, window_bounds = array<i64: 1, 8, 32>}]} {
    %c0_i32 = arith.constant 0 : i32
    %0 = arith.cmpi eq, %arg1, %c0_i32 : i32
    %1 = arith.extui %0 : i1 to i32
    %c0_i32_0 = arith.constant 0 : i32
    %2 = arith.cmpi ne, %1, %c0_i32_0 : i32
    scf.if %2 {
      %cst_11 = arith.constant 0.000000e+00 : f32
      %14 = vector.broadcast %cst_11 : f32 to vector<8x32xf32>
      %c0_12 = arith.constant 0 : index
      %c0_13 = arith.constant 0 : index
      %15 = vector.load %arg17[%c0_12, %c0_13] : memref<8x32xf32, #tpu.memory_space<vmem>>, vector<8x32xf32>
      tpu.vector_store %arg17[%c0_12, %c0_13], %14 {strides = array<i32>} : memref<8x32xf32, #tpu.memory_space<vmem>>, vector<8x32xf32>,
    } else {
    }
    %c0 = arith.constant 0 : index
    %c0_1 = arith.constant 0 : index
    %c0_2 = arith.constant 0 : index
    %3 = vector.load %arg2[%c0, %c0_1, %c0_2] : memref<1x32x16xf32, #tpu.memory_space<vmem>>, vector<1x32x16xf32>
    %4 = vector.shape_cast %3 : vector<1x32x16xf32> to vector<32x16xf32>
    %5 = arith.truncf %4 : vector<32x16xf32> to vector<32x16xbf16>
    %c0_3 = arith.constant 0 : index
    %c0_4 = arith.constant 0 : index
    %6 = vector.load %arg3[%c0_3, %c0_4] : memref<8x16xbf16, #tpu.memory_space<vmem>>, vector<8x16xbf16>
    %c0_5 = arith.constant 0 : index
    %c0_6 = arith.constant 0 : index
    %7 = vector.load %arg17[%c0_5, %c0_6] : memref<8x32xf32, #tpu.memory_space<vmem>>, vector<8x32xf32>
    %cst = arith.constant dense<0.000000e+00> : vector<8x32xf32>
    %8 = tpu.matmul %6, %5, %cst {dimension_numbers = #tpu.dot_dimension_numbers<[1], [1], [0], [0], [0, 0, 1, 0], [], []>} : vector<8x16xbf16>, vector<32x16xbf16>, vector<8x32xf32> -> vector<8x32xf32>
    %9 = arith.addf %7, %8 : vector<8x32xf32>
    %c0_7 = arith.constant 0 : index
    %c0_8 = arith.constant 0 : index
    %10 = vector.load %arg17[%c0_7, %c0_8] : memref<8x32xf32, #tpu.memory_space<vmem>>, vector<8x32xf32>
    tpu.vector_store %arg17[%c0_7, %c0_8], %9 {strides = array<i32>} : memref<8x32xf32, #tpu.memory_space<vmem>>, vector<8x32xf32>,
    %c0_i32_9 = arith.constant 0 : i32
    %11 = arith.cmpi eq, %arg1, %c0_i32_9 : i32
    %12 = arith.extui %11 : i1 to i32
    %c0_i32_10 = arith.constant 0 : i32
    %13 = arith.cmpi ne, %12, %c0_i32_10 : i32
    scf.if %13 {
      %c0_11 = arith.constant 0 : index
      %c0_12 = arith.constant 0 : index
      %14 = vector.load %arg17[%c0_11, %c0_12] : memref<8x32xf32, #tpu.memory_space<vmem>>, vector<8x32xf32>
      %c0_13 = arith.constant 0 : index
      %c0_14 = arith.constant 0 : index
      %15 = vector.load %arg5[%c0_13, %c0_14] : memref<1x32xf32, #tpu.memory_space<vmem>>, vector<1x32xf32>
      %c0_15 = arith.constant 0 : index
      %c0_16 = arith.constant 0 : index
      %16 = vector.load %arg6[%c0_15, %c0_16] : memref<1x32xf32, #tpu.memory_space<vmem>>, vector<1x32xf32>
      %cst_17 = arith.constant dense<0.000000e+00> : vector<8xf32>
      %17 = vector.multi_reduction <add>, %14, %cst_17 [1] : vector<8x32xf32> to vector<8xf32>
      %18 = vector.shape_cast %17 : vector<8xf32> to vector<8x1xf32>
      %cst_18 = arith.constant 3.200000e+01 : f32
      %19 = vector.broadcast %cst_18 : f32 to vector<8x1xf32>
      %20 = arith.divf %18, %19 : vector<8x1xf32>
      %21 = vector.broadcast %20 : vector<8x1xf32> to vector<8x32xf32>
      %22 = arith.subf %14, %21 : vector<8x32xf32>
      %23 = arith.mulf %22, %22 : vector<8x32xf32>
      %cst_19 = arith.constant dense<0.000000e+00> : vector<8xf32>
      %24 = vector.multi_reduction <add>, %23, %cst_19 [1] : vector<8x32xf32> to vector<8xf32>
      %25 = vector.shape_cast %24 : vector<8xf32> to vector<8x1xf32>
      %cst_20 = arith.constant 3.200000e+01 : f32
      %26 = vector.broadcast %cst_20 : f32 to vector<8x1xf32>
      %27 = arith.divf %25, %26 : vector<8x1xf32>
      %28 = vector.broadcast %20 : vector<8x1xf32> to vector<8x32xf32>
      %29 = arith.subf %14, %28 : vector<8x32xf32>
      %cst_21 = arith.constant 9.99999974E-6 : f32
      %30 = vector.broadcast %cst_21 : f32 to vector<8x1xf32>
      %31 = arith.addf %27, %30 : vector<8x1xf32>
      %32 = math.rsqrt %31 : vector<8x1xf32>
      %33 = vector.broadcast %32 : vector<8x1xf32> to vector<8x32xf32>
      %34 = arith.mulf %29, %33 : vector<8x32xf32>
      %35 = vector.broadcast %15 : vector<1x32xf32> to vector<8x32xf32>
      %36 = arith.mulf %34, %35 : vector<8x32xf32>
      %37 = vector.broadcast %16 : vector<1x32xf32> to vector<8x32xf32>
      %38 = arith.addf %36, %37 : vector<8x32xf32>
      %39 = arith.truncf %38 : vector<8x32xf32> to vector<8x32xbf16>
      %c0_22 = arith.constant 0 : index
      %c0_23 = arith.constant 0 : index
      %40 = vector.load %arg7[%c0_22, %c0_23] : memref<32x32xbf16, #tpu.memory_space<vmem>>, vector<32x32xbf16>
      %cst_24 = arith.constant dense<0.000000e+00> : vector<8x32xf32>
      %41 = tpu.matmul %39, %40, %cst_24 {dimension_numbers = #tpu.dot_dimension_numbers<[1], [1], [0], [0], [0, 0, 1, 0], [], []>} : vector<8x32xbf16>, vector<32x32xbf16>, vector<8x32xf32> -> vector<8x32xf32>
      %c0_25 = arith.constant 0 : index
      %c0_26 = arith.constant 0 : index
      %42 = vector.load %arg8[%c0_25, %c0_26] : memref<1x32xf32, #tpu.memory_space<vmem>>, vector<1x32xf32>
      %43 = vector.broadcast %42 : vector<1x32xf32> to vector<8x32xf32>
      %44 = arith.addf %41, %43 : vector<8x32xf32>
      %cst_27 = arith.constant 0.353553385 : f32
      %45 = vector.broadcast %cst_27 : f32 to vector<8x32xf32>
      %46 = arith.mulf %44, %45 : vector<8x32xf32>
      %c0_28 = arith.constant 0 : index
      %c0_29 = arith.constant 0 : index
      %47 = vector.load %arg9[%c0_28, %c0_29] : memref<32x32xbf16, #tpu.memory_space<vmem>>, vector<32x32xbf16>
      %cst_30 = arith.constant dense<0.000000e+00> : vector<8x32xf32>
      %48 = tpu.matmul %39, %47, %cst_30 {dimension_numbers = #tpu.dot_dimension_numbers<[1], [1], [0], [0], [0, 0, 1, 0], [], []>} : vector<8x32xbf16>, vector<32x32xbf16>, vector<8x32xf32> -> vector<8x32xf32>
      %c0_31 = arith.constant 0 : index
      %c0_32 = arith.constant 0 : index
      %49 = vector.load %arg10[%c0_31, %c0_32] : memref<1x32xf32, #tpu.memory_space<vmem>>, vector<1x32xf32>
      %50 = vector.broadcast %49 : vector<1x32xf32> to vector<8x32xf32>
      %51 = arith.addf %48, %50 : vector<8x32xf32>
      %c0_33 = arith.constant 0 : index
      %c0_34 = arith.constant 0 : index
      %52 = vector.load %arg11[%c0_33, %c0_34] : memref<32x32xbf16, #tpu.memory_space<vmem>>, vector<32x32xbf16>
      %cst_35 = arith.constant dense<0.000000e+00> : vector<8x32xf32>
      %53 = tpu.matmul %39, %52, %cst_35 {dimension_numbers = #tpu.dot_dimension_numbers<[1], [1], [0], [0], [0, 0, 1, 0], [], []>} : vector<8x32xbf16>, vector<32x32xbf16>, vector<8x32xf32> -> vector<8x32xf32>
      %c0_36 = arith.constant 0 : index
      %c0_37 = arith.constant 0 : index
      %54 = vector.load %arg12[%c0_36, %c0_37] : memref<1x32xf32, #tpu.memory_space<vmem>>, vector<1x32xf32>
      %55 = vector.broadcast %54 : vector<1x32xf32> to vector<8x32xf32>
      %56 = arith.addf %53, %55 : vector<8x32xf32>
      %57 = arith.truncf %46 : vector<8x32xf32> to vector<8x32xbf16>
      %58 = arith.truncf %51 : vector<8x32xf32> to vector<8x32xbf16>
      %59 = arith.truncf %56 : vector<8x32xf32> to vector<8x32xbf16>
      %60 = vector.extract_strided_slice %57 {offsets = [0, 0], sizes = [8, 8], strides = [1, 1]} : vector<8x32xbf16> to vector<8x8xbf16>
      %61 = vector.extract_strided_slice %57 {offsets = [0, 8], sizes = [8, 8], strides = [1, 1]} : vector<8x32xbf16> to vector<8x8xbf16>
      %62 = vector.extract_strided_slice %57 {offsets = [0, 16], sizes = [8, 8], strides = [1, 1]} : vector<8x32xbf16> to vector<8x8xbf16>
      %63 = vector.extract_strided_slice %57 {offsets = [0, 24], sizes = [8, 8], strides = [1, 1]} : vector<8x32xbf16> to vector<8x8xbf16>
      %64 = vector.shape_cast %60 : vector<8x8xbf16> to vector<1x8x8xbf16>
      %65 = vector.shape_cast %61 : vector<8x8xbf16> to vector<1x8x8xbf16>
      %66 = vector.shape_cast %62 : vector<8x8xbf16> to vector<1x8x8xbf16>
      %67 = vector.shape_cast %63 : vector<8x8xbf16> to vector<1x8x8xbf16>
      %68 = tpu.concatenate %64, %65, %66, %67 in 0 : vector<1x8x8xbf16>, vector<1x8x8xbf16>, vector<1x8x8xbf16>, vector<1x8x8xbf16> -> vector<4x8x8xbf16>
      %69 = vector.extract_strided_slice %58 {offsets = [0, 0], sizes = [8, 8], strides = [1, 1]} : vector<8x32xbf16> to vector<8x8xbf16>
      %70 = vector.extract_strided_slice %58 {offsets = [0, 8], sizes = [8, 8], strides = [1, 1]} : vector<8x32xbf16> to vector<8x8xbf16>
      %71 = vector.extract_strided_slice %58 {offsets = [0, 16], sizes = [8, 8], strides = [1, 1]} : vector<8x32xbf16> to vector<8x8xbf16>
      %72 = vector.extract_strided_slice %58 {offsets = [0, 24], sizes = [8, 8], strides = [1, 1]} : vector<8x32xbf16> to vector<8x8xbf16>
      %73 = vector.shape_cast %69 : vector<8x8xbf16> to vector<1x8x8xbf16>
      %74 = vector.shape_cast %70 : vector<8x8xbf16> to vector<1x8x8xbf16>
      %75 = vector.shape_cast %71 : vector<8x8xbf16> to vector<1x8x8xbf16>
      %76 = vector.shape_cast %72 : vector<8x8xbf16> to vector<1x8x8xbf16>
      %77 = tpu.concatenate %73, %74, %75, %76 in 0 : vector<1x8x8xbf16>, vector<1x8x8xbf16>, vector<1x8x8xbf16>, vector<1x8x8xbf16> -> vector<4x8x8xbf16>
      %78 = vector.extract_strided_slice %59 {offsets = [0, 0], sizes = [8, 8], strides = [1, 1]} : vector<8x32xbf16> to vector<8x8xbf16>
      %79 = vector.extract_strided_slice %59 {offsets = [0, 8], sizes = [8, 8], strides = [1, 1]} : vector<8x32xbf16> to vector<8x8xbf16>
      %80 = vector.extract_strided_slice %59 {offsets = [0, 16], sizes = [8, 8], strides = [1, 1]} : vector<8x32xbf16> to vector<8x8xbf16>
      %81 = vector.extract_strided_slice %59 {offsets = [0, 24], sizes = [8, 8], strides = [1, 1]} : vector<8x32xbf16> to vector<8x8xbf16>
      %82 = vector.shape_cast %78 : vector<8x8xbf16> to vector<1x8x8xbf16>
      %83 = vector.shape_cast %79 : vector<8x8xbf16> to vector<1x8x8xbf16>
      %84 = vector.shape_cast %80 : vector<8x8xbf16> to vector<1x8x8xbf16>
      %85 = vector.shape_cast %81 : vector<8x8xbf16> to vector<1x8x8xbf16>
      %86 = tpu.concatenate %82, %83, %84, %85 in 0 : vector<1x8x8xbf16>, vector<1x8x8xbf16>, vector<1x8x8xbf16>, vector<1x8x8xbf16> -> vector<4x8x8xbf16>
      %cst_38 = arith.constant dense<0.000000e+00> : vector<4x8x8xf32>
      %87 = tpu.matmul %68, %77, %cst_38 {dimension_numbers = #tpu.dot_dimension_numbers<[2], [2], [1], [1], [0, 0, 0, 1, 1, 1], [0], [0]>} : vector<4x8x8xbf16>, vector<4x8x8xbf16>, vector<4x8x8xf32> -> vector<4x8x8xf32>
      %c0_39 = arith.constant 0 : index
      %c0_40 = arith.constant 0 : index
      %c0_41 = arith.constant 0 : index
      %88 = vector.load %arg4[%c0_39, %c0_40, %c0_41] : memref<8x8x8xbf16, #tpu.memory_space<vmem>>, vector<8x8x8xbf16>
      %cst_42 = arith.constant dense<0.000000e+00> : vector<8x4x8xf32>
      %89 = tpu.matmul %68, %88, %cst_42 {dimension_numbers = #tpu.dot_dimension_numbers<[2], [2], [0], [1], [0, 1, 0, 0, 1, 1], [1], [0]>} : vector<4x8x8xbf16>, vector<8x8x8xbf16>, vector<8x4x8xf32> -> vector<8x4x8xf32>
      %90 = vector.extract_strided_slice %89 {offsets = [0, 0, 0], sizes = [8, 1, 8], strides = [1, 1, 1]} : vector<8x4x8xf32> to vector<8x1x8xf32>
      %91 = vector.shape_cast %90 : vector<8x1x8xf32> to vector<8x8xf32>
      %92 = vector.extract_strided_slice %89 {offsets = [0, 1, 0], sizes = [8, 1, 8], strides = [1, 1, 1]} : vector<8x4x8xf32> to vector<8x1x8xf32>
      %93 = vector.shape_cast %92 : vector<8x1x8xf32> to vector<8x8xf32>
      %94 = vector.extract_strided_slice %89 {offsets = [0, 2, 0], sizes = [8, 1, 8], strides = [1, 1, 1]} : vector<8x4x8xf32> to vector<8x1x8xf32>
      %95 = vector.shape_cast %94 : vector<8x1x8xf32> to vector<8x8xf32>
      %96 = vector.extract_strided_slice %89 {offsets = [0, 3, 0], sizes = [8, 1, 8], strides = [1, 1, 1]} : vector<8x4x8xf32> to vector<8x1x8xf32>
      %97 = vector.shape_cast %96 : vector<8x1x8xf32> to vector<8x8xf32>
      %98 = vector.shape_cast %91 : vector<8x8xf32> to vector<1x8x8xf32>
      %99 = vector.shape_cast %93 : vector<8x8xf32> to vector<1x8x8xf32>
      %100 = vector.shape_cast %95 : vector<8x8xf32> to vector<1x8x8xf32>
      %101 = vector.shape_cast %97 : vector<8x8xf32> to vector<1x8x8xf32>
      %102 = tpu.concatenate %98, %99, %100, %101 in 0 : vector<1x8x8xf32>, vector<1x8x8xf32>, vector<1x8x8xf32>, vector<1x8x8xf32> -> vector<4x8x8xf32>
      %103 = arith.addf %87, %102 : vector<4x8x8xf32>
      %cst_43 = arith.constant dense<0xFF800000> : vector<4x8xf32>
      %104 = vector.multi_reduction <maximumf>, %103, %cst_43 [2] : vector<4x8x8xf32> to vector<4x8xf32>
      %105 = vector.shape_cast %104 : vector<4x8xf32> to vector<4x8x1xf32>
      %106 = vector.broadcast %105 : vector<4x8x1xf32> to vector<4x8x8xf32>
      %107 = arith.subf %103, %106 : vector<4x8x8xf32>
      %108 = math.exp %107 : vector<4x8x8xf32>
      %cst_44 = arith.constant dense<0.000000e+00> : vector<4x8xf32>
      %109 = vector.multi_reduction <add>, %108, %cst_44 [2] : vector<4x8x8xf32> to vector<4x8xf32>
      %110 = vector.shape_cast %109 : vector<4x8xf32> to vector<4x8x1xf32>
      %111 = tpu.reciprocal %110 {approx = true} : vector<4x8x1xf32> -> vector<4x8x1xf32>
      %112 = vector.broadcast %111 : vector<4x8x1xf32> to vector<4x8x8xf32>
      %113 = arith.mulf %108, %112 : vector<4x8x8xf32>
      %114 = arith.truncf %113 : vector<4x8x8xf32> to vector<4x8x8xbf16>
      %cst_45 = arith.constant dense<0.000000e+00> : vector<4x8x8xf32>
      %115 = tpu.matmul %114, %86, %cst_45 {dimension_numbers = #tpu.dot_dimension_numbers<[2], [1], [1], [2], [0, 0, 0, 1, 1, 2], [0], [0]>} : vector<4x8x8xbf16>, vector<4x8x8xbf16>, vector<4x8x8xf32> -> vector<4x8x8xf32>
      %116 = vector.extract_strided_slice %115 {offsets = [0, 0, 0], sizes = [1, 8, 8], strides = [1, 1, 1]} : vector<4x8x8xf32> to vector<1x8x8xf32>
      %117 = vector.shape_cast %116 : vector<1x8x8xf32> to vector<8x8xf32>
      %118 = vector.extract_strided_slice %115 {offsets = [1, 0, 0], sizes = [1, 8, 8], strides = [1, 1, 1]} : vector<4x8x8xf32> to vector<1x8x8xf32>
      %119 = vector.shape_cast %118 : vector<1x8x8xf32> to vector<8x8xf32>
      %120 = vector.extract_strided_slice %115 {offsets = [2, 0, 0], sizes = [1, 8, 8], strides = [1, 1, 1]} : vector<4x8x8xf32> to vector<1x8x8xf32>
      %121 = vector.shape_cast %120 : vector<1x8x8xf32> to vector<8x8xf32>
      %122 = vector.extract_strided_slice %115 {offsets = [3, 0, 0], sizes = [1, 8, 8], strides = [1, 1, 1]} : vector<4x8x8xf32> to vector<1x8x8xf32>
      %123 = vector.shape_cast %122 : vector<1x8x8xf32> to vector<8x8xf32>
      %124 = tpu.concatenate %117, %119, %121, %123 in 1 : vector<8x8xf32>, vector<8x8xf32>, vector<8x8xf32>, vector<8x8xf32> -> vector<8x32xf32>
      %125 = arith.truncf %124 : vector<8x32xf32> to vector<8x32xbf16>
      %c0_46 = arith.constant 0 : index
      %c0_47 = arith.constant 0 : index
      %126 = vector.load %arg13[%c0_46, %c0_47] : memref<32x32xbf16, #tpu.memory_space<vmem>>, vector<32x32xbf16>
      %cst_48 = arith.constant dense<0.000000e+00> : vector<8x32xf32>
      %127 = tpu.matmul %125, %126, %cst_48 {dimension_numbers = #tpu.dot_dimension_numbers<[1], [1], [0], [0], [0, 0, 1, 0], [], []>} : vector<8x32xbf16>, vector<32x32xbf16>, vector<8x32xf32> -> vector<8x32xf32>
      %c0_49 = arith.constant 0 : index
      %c0_50 = arith.constant 0 : index
      %128 = vector.load %arg14[%c0_49, %c0_50] : memref<1x32xf32, #tpu.memory_space<vmem>>, vector<1x32xf32>
      %129 = vector.broadcast %128 : vector<1x32xf32> to vector<8x32xf32>
      %130 = arith.addf %127, %129 : vector<8x32xf32>
      %c0_51 = arith.constant 0 : index
      %c0_52 = arith.constant 0 : index
      %131 = vector.load %arg15[%c0_51, %c0_52] : memref<1x32xf32, #tpu.memory_space<vmem>>, vector<1x32xf32>
      %132 = vector.broadcast %131 : vector<1x32xf32> to vector<8x32xf32>
      %133 = arith.mulf %130, %132 : vector<8x32xf32>
      %c0_53 = arith.constant 0 : index
      %c0_54 = arith.constant 0 : index
      %c0_55 = arith.constant 0 : index
      %134 = vector.load %arg16[%c0_53, %c0_54, %c0_55] : memref<1x8x32xf32, #tpu.memory_space<vmem>>, vector<1x8x32xf32>
      %135 = vector.shape_cast %134 : vector<1x8x32xf32> to vector<8x32xf32>
      %136 = vector.shape_cast %133 : vector<8x32xf32> to vector<1x8x32xf32>
      tpu.vector_store %arg16[%c0_53, %c0_54, %c0_55], %136 {strides = array<i32>} : memref<1x8x32xf32, #tpu.memory_space<vmem>>, vector<1x8x32xf32>,
    } else {
    }
    return
  }
  func.func @transform_0(%arg0: i32, %arg1: i32) -> (i32, i32, i32) {
    %c0_i32 = arith.constant 0 : i32
    %c0_i32_0 = arith.constant 0 : i32
    return %arg0, %c0_i32, %arg1 : i32, i32, i32
  }
  func.func @transform_1(%arg0: i32, %arg1: i32) -> (i32, i32) {
    %c0_i32 = arith.constant 0 : i32
    %c0_i32_0 = arith.constant 0 : i32
    return %c0_i32, %arg1 : i32, i32
  }
  func.func @transform_2(%arg0: i32, %arg1: i32) -> (i32, i32, i32) {
    %c0_i32 = arith.constant 0 : i32
    %c0_i32_0 = arith.constant 0 : i32
    %c0_i32_1 = arith.constant 0 : i32
    %c0_i32_2 = arith.constant 0 : i32
    return %c0_i32, %c0_i32_0, %c0_i32_1 : i32, i32, i32
  }
  func.func @transform_3(%arg0: i32, %arg1: i32) -> (i32, i32) {
    %c0_i32 = arith.constant 0 : i32
    %c0_i32_0 = arith.constant 0 : i32
    %c0_i32_1 = arith.constant 0 : i32
    return %c0_i32, %c0_i32_0 : i32, i32
  }
  func.func @transform_4(%arg0: i32, %arg1: i32) -> (i32, i32) {
    %c0_i32 = arith.constant 0 : i32
    %c0_i32_0 = arith.constant 0 : i32
    %c0_i32_1 = arith.constant 0 : i32
    return %c0_i32, %c0_i32_0 : i32, i32
  }
  func.func @transform_5(%arg0: i32, %arg1: i32) -> (i32, i32) {
    %c0_i32 = arith.constant 0 : i32
    %c0_i32_0 = arith.constant 0 : i32
    %c0_i32_1 = arith.constant 0 : i32
    return %c0_i32, %c0_i32_0 : i32, i32
  }
  func.func @transform_6(%arg0: i32, %arg1: i32) -> (i32, i32) {
    %c0_i32 = arith.constant 0 : i32
    %c0_i32_0 = arith.constant 0 : i32
    %c0_i32_1 = arith.constant 0 : i32
    return %c0_i32, %c0_i32_0 : i32, i32
  }
  func.func @transform_7(%arg0: i32, %arg1: i32) -> (i32, i32) {
    %c0_i32 = arith.constant 0 : i32
    %c0_i32_0 = arith.constant 0 : i32
    %c0_i32_1 = arith.constant 0 : i32
    return %c0_i32, %c0_i32_0 : i32, i32
  }
  func.func @transform_8(%arg0: i32, %arg1: i32) -> (i32, i32) {
    %c0_i32 = arith.constant 0 : i32
    %c0_i32_0 = arith.constant 0 : i32
    %c0_i32_1 = arith.constant 0 : i32
    return %c0_i32, %c0_i32_0 : i32, i32
  }
  func.func @transform_9(%arg0: i32, %arg1: i32) -> (i32, i32) {
    %c0_i32 = arith.constant 0 : i32
    %c0_i32_0 = arith.constant 0 : i32
    %c0_i32_1 = arith.constant 0 : i32
    return %c0_i32, %c0_i32_0 : i32, i32
  }
  func.func @transform_10(%arg0: i32, %arg1: i32) -> (i32, i32) {
    %c0_i32 = arith.constant 0 : i32
    %c0_i32_0 = arith.constant 0 : i32
    %c0_i32_1 = arith.constant 0 : i32
    return %c0_i32, %c0_i32_0 : i32, i32
  }
  func.func @transform_11(%arg0: i32, %arg1: i32) -> (i32, i32) {
    %c0_i32 = arith.constant 0 : i32
    %c0_i32_0 = arith.constant 0 : i32
    %c0_i32_1 = arith.constant 0 : i32
    return %c0_i32, %c0_i32_0 : i32, i32
  }
  func.func @transform_12(%arg0: i32, %arg1: i32) -> (i32, i32) {
    %c0_i32 = arith.constant 0 : i32
    %c0_i32_0 = arith.constant 0 : i32
    %c0_i32_1 = arith.constant 0 : i32
    return %c0_i32, %c0_i32_0 : i32, i32
  }
  func.func @transform_13(%arg0: i32, %arg1: i32) -> (i32, i32) {
    %c0_i32 = arith.constant 0 : i32
    %c0_i32_0 = arith.constant 0 : i32
    %c0_i32_1 = arith.constant 0 : i32
    return %c0_i32, %c0_i32_0 : i32, i32
  }
  func.func @transform_14(%arg0: i32, %arg1: i32) -> (i32, i32, i32) {
    %c0_i32 = arith.constant 0 : i32
    %c0_i32_0 = arith.constant 0 : i32
    %c0_i32_1 = arith.constant 0 : i32
    return %arg0, %c0_i32, %c0_i32_0 : i32, i32, i32
  }
}

</mosaic_0001>

<bundles_post_ra>
// kernel: tpu_custom_call.1
= control target key start
LH: loop header
LB: loop body
LE: loop exit
PB: predicated region body
PF: predicated region fallthrough
CT: control target
= control target key end

     0   :  { %19 = vsyncpa [#allocation4], 0  ;;  %s2995_s0 = inlined_call_operand.vmem [shape: f32[2,32,16], index: 0, kind: input, shape index: {}]   ;;  %s2996_s1 = inlined_call_operand.hbm [shape: bf16[8,16], index: 1, kind: input, shape index: {}]   ;;  %s2997_s2 = inlined_call_operand.vmem [shape: bf16[8,8,8], index: 2, kind: input, shape index: {}]   ;;  %s2998_s3 = inlined_call_operand.vmem [shape: f32[1,32], index: 3, kind: input, shape index: {}]   ;;  %s2999_s4 = inlined_call_operand.vmem [shape: f32[1,32], index: 4, kind: input, shape index: {}]   ;;  %s3000_s5 = inlined_call_operand.vmem [shape: bf16[32,32], index: 5, kind: input, shape index: {}]   ;;  %s3001_s6 = inlined_call_operand.vmem [shape: f32[1,32], index: 6, kind: input, shape index: {}]   ;;  %s3002_s7 = inlined_call_operand.vmem [shape: bf16[32,32], index: 7, kind: input, shape index: {}]   ;;  %s3003_s8 = inlined_call_operand.vmem [shape: f32[1,32], index: 8, kind: input, shape index: {}]   ;;  %s3004_s9 = inlined_call_operand.vmem [shape: bf16[32,32], index: 9, kind: input, shape index: {}]   ;;  %s3005_s10 = inlined_call_operand.vmem [shape: f32[1,32], index: 10, kind: input, shape index: {}]   ;;  %s3006_s11 = inlined_call_operand.vmem [shape: bf16[32,32], index: 11, kind: input, shape index: {}]   ;;  %s3007_s12 = inlined_call_operand.vmem [shape: f32[1,32], index: 12, kind: input, shape index: {}]   ;;  %s3008_s13 = inlined_call_operand.vmem [shape: f32[1,32], index: 13, kind: input, shape index: {}]   ;;  %s3009_s14 = inlined_call_operand.hbm [shape: f32[2,8,32], index: 14, kind: output, shape index: {}]  }
   0x1   :  { %20 = vsyncpa [#allocation5], 0 }
   0x2   :  { %22 = vsyncpa [#allocation5 + $0x1], 0  ;;  %s2574_s29 = smov 0   ;;  %s2576_s30 = smov 0  }
   0x3   :  { %s2578_s15 = smov 0   ;;  %s2580_s16 = smov 0  }
   0x4   :  { %s2582_s17 = smov 0   ;;  %s2584_s18 = smov 0  }
   0x5 LB: > { %3019 = sst [smem:[#allocation9_spill]] %s2464_s29  ;;  %s2019_s19 = sadd.s32 4294967295, %s2484_s18   ;;  %s2484_s18 = sphi %s2584_s18, %s28_s18   ;;  %s2480_s17 = sphi %s2582_s17, %s3039_s17   ;;  %s2476_s16 = sphi %s2580_s16, %s3038_s16   ;;  %s2472_s15 = sphi %s2578_s15, %s3037_s15   ;;  %s2468_s30 = sphi %s2576_s30, %s3041_s30   ;;  %s2464_s29 = sphi %s2574_s29, %s3040_s29  }
   0x6   : > { %3020 = sst [smem:[#allocation10_spill]] %s2472_s15  ;;  %s2020_s20 = sadd.s32 4294967294, %s2484_s18  }
   0x7   : > { %3021 = sst [smem:[#allocation11_spill]] %s2480_s17  ;;  %s40_s21 = sadd.s32 1, %s2480_s17 }
   0x8   : > { %s353_s22 = sadd.s32 1, %s2472_s15  ;;  %p42_p0 = scmp.ge.s32.totalorder %s40_s21, 2 }
   0x9   : > { %p363_p1 = scmp.ne.s32.totalorder %s2472_s15, %s2468_s30  ;;  %p364_p2 = scmp.eq.s32.totalorder %s2019_s19, 1 }
   0xa   : > { %p369_p3 = scmp.ne.s32.totalorder %s2468_s30, %s2464_s29  ;;  %s3043_s21 = smov (%p42_p0, %s40_s21), 0 }
   0xb   : > { %3022 = sst [smem:[#allocation12_spill]] %s3043_s21  ;;  %p2614_p4 = por %p364_p2, %p363_p1 }
   0xc   : > { %p370_p5 = scmp.eq.s32.totalorder %s2020_s20, 1  ;;  %s350_s24 = ssub.s32 %s2480_s17, %s3043_s21 }
   0xd   : > { %s3023_s23 = scalar_select %p2614_p4, 1, 0 }
   0xe   : > { %p2021_p6 = scmp.ge.s32.totalorder %s2484_s18, 1  ;;  %p351_p7 = scmp.eq.s32.totalorder %s350_s24, 0 }
   0xf   : > { %p2621_p8 = por %p370_p5, %p369_p3  ;;  %p377_p9 = scmp.lt.s32.totalorder %s2484_s18, 3 }
  0x10   : > { %s2627_s26 = scalar_select %p351_p7, %s2472_s15, %s353_s22  }
  0x11   : > { %s3024_s25 = scalar_select %p2621_p8, 1, 0 }
  0x12   : > { %3026 = sst [smem:[#allocation14_spill]] %s2627_s26  ;;  %p2629_p10 = pnand %p2021_p6, %p377_p9 }
  0x13   : > { %3025 = sst [smem:[#allocation13_spill]] %s3024_s25  ;;  %p2633_p11 = scmp.eq.s32.totalorder %s2019_s19, 0 }
  0x14   : > { %s3027_s27 = scalar_select %p2629_p10, 1, 0 }
  0x15   : > { %s3028_s28 = scalar_select %p2633_p11, 1, 0 }
  0x16   : > { %p2277_p12 = pneg %p2629_p10  ;;  %s2486_s20 = smov [#allocation3]  }
  0x17   : > { %s392_s24 = sshll.u32 %s2486_s20, 4  ;;  %s2374_s26 = scalar_lea.hbm %s2996_s1, 64  ;;  %s393_s24 = int_to_ptr.vmem [resolvable:$true] %s392_s24 }
  0x18   : > { %p2641_p13 = pnand %p2633_p11, %p2277_p12  ;;  %p2375_p0 = scmp.ne.s32.totalorder %s2996_s1, %s2374_s26 }
  0x19   : > { %p2381_p5 = scmp.lt.u32.totalorder %s2374_s26, %s2996_s1 }
  0x1a   : > { %p2376_p1 = pneg %p2641_p13 }
  0x1c   : > { %p2377_p2 = pnand %p2376_p1, %p2375_p0 }
  0x1e   : > { %p2378_p3 = pneg %p2377_p2 }
  0x20   : > { %p2383_p6 = pnand %p2381_p5, %p2378_p3 }
  0x22   : > { %2386 = shalt.err (!%p2383_p6)
}
  0x23   : > { %s2387_s29 = scalar_lea.vmem %s393_s24, 64  ;;  %p2395_p8 = scmp.lt.s32.totalorder %s393_s24, %s393_s24 }
  0x24   : > { %p2388_p7 = scmp.ne.s32.totalorder %s393_s24, %s2387_s29  ;;  %p2396_p4 = scmp.lt.s32.totalorder %s2387_s29, %s2387_s29 }
  0x26   : > { %p2390_p9 = pnand %p2388_p7, %p2376_p1  ;;  %p2397_p11 = por %p2396_p4, %p2395_p8 }
  0x28   : > { %p2391_p12 = pneg %p2390_p9 }
  0x2a   : > { %p2398_p10 = pnand %p2397_p11, %p2391_p12 }
  0x2c   : > { %2401 = shalt.err (!%p2398_p10)
}
  0x2d   : > { %2280 = dma.hbm_to_vmem [thread:$0]  (!%p2641_p13), %s2996_s1, 64, %s393_s24, [#allocation4]  }
  0x2e   : > { %p3030_p0 = scmp.ne.s32.totalorder %s3027_s27, 0 }
  0x2f   : > { %p3031_p2 = scmp.ne.s32.totalorder (!%p3030_p0), %s3028_s28, 0 }
  0x30   : > { %452 = sbr.rel (%p3030_p0) target bundleno = 2101 (0x835), region = 76 }
  0x37   : > { %2455 = dma.done.wait (%p3031_p2), [#allocation4], 64  }
  0x38   : > { %2457 = vsyncadd (%p3031_p2), [#allocation4], 4294967232  ;;  %p501_p4 = scmp.lt.s32.totalorder %s2476_s16, 1  ;;  %v2487_v0 = vmov 0.0   ;;  %vm2488_vm0 = vmmov 0   ;;  %vm514_vm1 = vcmask 261120  }
  0x39   : > { %2135 = vmatprep.subr.bf16.mxu0 %v2487_v0  ;;  %2139 = vmatprep.mubr.msk.bf16.mxu0 %vm2488_vm0, %v2487_v0  ;;  %515 = vst.msk [vmem:[#allocation2] sm:$0xff] %vm514_vm1, %v2487_v0  ;;  %vm524_vm2 = vcmask 130048   ;;  %v522_v9 = vld [vmem:[#allocation3] sm:$0xf]  ;;  %v2348_v23 = vld [vmem:[%s3000_s5] sm:$0xff]   ;;  %vm940_vm3 = vcmask 64512  }
  0x3a   : > { %s502_s29 = scalar_select %p501_p4, %s2476_s16, 1  ;;  %2143 = vmatprep.subr.bf16.mxu1 %v2487_v0  ;;  %2147 = vmatprep.mubr.msk.bf16.mxu1 %vm2488_vm0, %v2487_v0  ;;  %v2349_v24 = vld [vmem:[%s3002_s7] sm:$0xff]   ;;  %v637_v25 = vsel %vm514_vm1, %v2348_v23, 0  ;;  %v2350_v27 = vld [vmem:[%s3000_s5 + $0x8] sm:$0xff]   ;;  %vm1640_vm4 = vcmask 1043456   ;;  %vm1342_vm5 = vcmask 1041409  }
  0x3b   : > { %v705_v26 = vsel %vm514_vm1, %v2349_v24, 0  ;;  %2144 = vmatpush3.bf16.xpose.msra.mxu1 %v637_v25  ;;  %v2351_v28 = vld [vmem:[%s3002_s7 + $0x8] sm:$0xff]   ;;  %v640_v29 = vsel %vm514_vm1, %v2350_v27, 0  ;;  %v2030_v35 = vld [vmem:[%s2998_s3] ss:$0 sm:$0xff]  ;;  %s2489_s28 = smov 104  }
  0x3c   : > { %s2087_s21 = sshll.u32 %s502_s29, 5  ;;  %2145 = vmatprep.subr.bf16.mxu1 %v2487_v0  ;;  %v708_v30 = vsel %vm514_vm1, %v2351_v28, 0  ;;  %v2031_v37 = vld [vmem:[%s2999_s4] ss:$0 sm:$0xff]  ;;  %v2353_v43 = vld [vmem:[%s3004_s9 + $0x8] sm:$0xff]   ;;  %s2490_s24 = smov 120  }
  0x3d   : > { %s508_s27 = scalar_lea.vmem %s2995_s0, %s2087_s21  ;;  %v2352_v39 = vld [vmem:[%s3004_s9] sm:$0xff]   ;;  %v775_v44 = vsel %vm514_vm1, %v2353_v43, 0  ;;  %v843_v50 = vld [vmem:[%s2997_s2 + $0x8] sm:$0xf]  ;;  %s2491_s22 = smov 112   ;;  %v2494_v28 = vmov 0  }
  0x3e   : > { %v516_v1 = vld [vmem:[%s508_s27] sm:$0xff]  ;;  %v517_v2 = vld [vmem:[%s508_s27 + $0x8] sm:$0xff]  ;;  %v518_v4 = vld [vmem:[%s508_s27 + $0x10] sm:$0xff]  ;;  %v772_v42 = vsel %vm514_vm1, %v2352_v39, 0  ;;  %v1037_v54 = vsel %vm940_vm3, %v843_v50, 0  ;;  %vm1345_vm6 = vcmask 1042434  }
  0x3f   : > { %v520_v3 = vpack.c.bf16 %v517_v2, %v516_v1  ;;  %v519_v5 = vld [vmem:[%s508_s27 + $0x18] sm:$0xff]  ;;  %v2032_v45 = vld [vmem:[%s3001_s6] ss:$0 sm:$0xff]  ;;  %v842_v25 = vld [vmem:[%s2997_s2 + $0x4] sm:$0xf]  ;;  %vm1348_vm7 = vcmask 1043459  }
  0x40   : > { %v521_v7 = vpack.c.bf16 %v519_v5, %v518_v4  ;;  %v523_v10 = vld [vmem:[#allocation2] sm:$0xff]  ;;  %v2492_v5 = vmov 1983009808   ;;  %v845_v27 = vld [vmem:[%s2997_s2 + $0x10] sm:$0xf]  ;;  %vm1351_vm8 = vcmask 1044484  }
  0x41   : > { %v529_v6 = vsel %vm524_vm2, %v520_v3, 0  ;;  %v841_v46 = vld [vmem:[%s2997_s2] sm:$0xf]  ;;  %vm1353_vm9 = vcmask 1045509   ;;  %vm1355_vm10 = vcmask 1046534   ;;  %vm1357_vm11 = vcmask 1047559  }
  0x42   : > { %2136 = vmatpush3.bf16.xpose.msra.mxu0 %v529_v6  ;;  %v532_v8 = vsel %vm524_vm2, %v521_v7, 0  ;;  %v945_v47 = vsel %vm940_vm3, %v841_v46, 0  ;;  %v2036_v61 = vld [vmem:[%s3003_s8] ss:$0 sm:$0xff]  ;;  %v850_v6 = vunpack.c.l.s4 %v2492_v5  ;;  %v852_v7 = vlaneseq  ;;  %s2495_s25 = smov 8   ;;  %s2496_s26 = smov 16  }
  0x43   : > { %2137 = vmatprep.subr.bf16.mxu0 %v2487_v0  ;;  %2146 = vmatpush3.bf16.xpose.msra.mxu1 %v640_v29  ;;  %s2497_s27 = smov 24   ;;  %vm1836_vm12 = vcmask 195584   ;;  %s498_s19 = sand.u32 1, %s2468_s30  }
  0x44   : > { %2159 = vmatprep.subr.bf16.mxu1 %v2487_v0  ;;  %s2026_s20 = sshll.u32 %s498_s19, 3  ;;  %p3032_p10 = scmp.ne.s32.totalorder %s3023_s23, 0 }
  0x45   : > { %s2498_s15 = smov [#allocation6]  }
  0x46   : > { %s2406_s17 = sshll.u32 %s2498_s15, 4  ;;  %s2407_s17 = int_to_ptr.vmem [resolvable:$false] %s2406_s17 }
  0x47   : > { %s2408_s29 = scalar_lea.vmem %s2407_s17, 256 }
  0x4a   : > { %2138 = vmatpush3.bf16.xpose.msra.mxu0 %v532_v8  ;;  %v851_v8 = vunpack.c.0.s8 %v850_v6 }
  0x4b   : > { %2151 = vmatprep.subr.bf16.mxu0 %v2487_v0 }
  0x51   : > { %2140 = vmatmul.mubr.msk.bf16.vlgmr.msra.gmra.mrb[0].mxu0 %vm524_vm2, %v522_v9  ;;  %v853_v9 = vshrl.u32 %v852_v7, 7 }
  0x52   : > { %2155 = vmatprep.mubr.msk.bf16.mxu0 %vm2488_vm0, %v2487_v0  ;;  %2152 = vmatpush3.bf16.xpose.msra.mxu0 %v705_v26 }
  0x53   : > { %2153 = vmatprep.subr.bf16.mxu0 %v2487_v0 }
  0x5a   : > { %2154 = vmatpush3.bf16.xpose.msra.mxu0 %v708_v30 }
  0x5b   : > { %2179 = vmatprep.subr.bf16.mxu0 %v2487_v0 }
 0x124   : > { %v568_v11 = vpop.f32.mrb[0].mxu0 }
 0x125   : > { %v574_v12 = vadd.f32 %v568_v11, %v523_v10  ;;  %v2141_v13 = vpop.f32.mrb[1].mxu0  ;;  %v2493_v10 = vmov 1934713408  }
 0x126   : > { %v571_v14 = vpop.f32.mrb[2].mxu0  ;;  %v867_v11 = vunpack.c.l.s4 %v2493_v10 }
 0x127   : > { %576 = vst.msk [vmem:[#allocation2] sm:$0xff] %vm514_vm1, %v574_v12  ;;  %v2142_v15 = vpop.f32.mrb[3].mxu0  ;;  %v854_v12 = vsub.s32 %v851_v8, %v853_v9 }
 0x128   : > { %v868_v14 = vunpack.c.0.s8 %v867_v11 }
 0x12e   : > { %v580_v16 = vld [vmem:[#allocation2] sm:$0xff] }
 0x12f   : > { %v583_v17 = vsel %vm514_vm1, %v580_v16, 0.0 }
 0x130   : > { %584 = vadd.xlane.f32.xlu0 %v583_v17 }
 0x1bd   : > { %v585_v18 = vpop.xlane.xlu0 %584 }
 0x1be   : > { %v587_v19 = vmul.f32 0.03125, %v585_v18  ;;  %v871_v18 = vsub.s32 %v868_v14, %v853_v9 }
 0x1c0   : > { %v588_v20 = vsub.f32 %v580_v16, %v587_v19 }
 0x1c2   : > { %v589_v21 = vmul.f32 %v588_v20, %v588_v20 }
 0x1c4   : > { %v590_v22 = vsel %vm514_vm1, %v589_v21, 0.0 }
 0x1c5   : > { %591 = vadd.xlane.f32.xlu0 %v590_v22 }
 0x252   : > { %v592_v31 = vpop.xlane.xlu0 %591 }
 0x253   : > { %v593_v32 = vmul.f32 0.03125, %v592_v31 }
 0x255   : > { %v594_v33 = vadd.f32 1e-05, %v593_v32  ;;  %v991_v32 = vsel %vm940_vm3, %v842_v25, 0 }
 0x257   : > { %2356 = vrsqrt.f32 %v594_v33 }
 0x261   : > { %v2357_v34 = vpop.eup %2356 }
 0x262   : > { %v596_v36 = vmul.f32 %v2357_v34, %v588_v20 }
 0x264   : > { %v603_v38 = vmul.f32 %v2030_v35, %v596_v36  ;;  %v1129_v35 = vsel %vm940_vm3, %v845_v27, 0 }
 0x266   : > { %v610_v40 = vadd.f32 %v2031_v37, %v603_v38  ;;  %v844_v38 = vld [vmem:[%s2997_s2 + $0xc] sm:$0xf] }
 0x268   : > { %v611_v41 = vpack.c.bf16 %v610_v40, %v610_v40 }
 0x26a   : > { %2148 = vmatmul.mubr.msk.bf16.vlgmr.msra.gmra.mrb[0].mxu1 %vm514_vm1, %v611_v41  ;;  %2156 = vmatmul.mubr.msk.bf16.vlgmr.msra.gmra.mrb[4].mxu0 %vm514_vm1, %v611_v41 }
 0x26b   : > { %2160 = vmatpush3.bf16.xpose.msra.mxu1 %v772_v42  ;;  %2163 = vmatprep.mubr.msk.bf16.mxu1 %vm2488_vm0, %v2487_v0 }
 0x26c   : > { %2161 = vmatprep.subr.bf16.mxu1 %v2487_v0  ;;  %2181 = vmatprep.mubr.msk.bf16.mxu0 %vm2488_vm0, %v2487_v0 }
 0x26d   : > { %2180 = vmatpush3.bf16.xpose.msra.mxu0 %v1037_v54 }
 0x26e   : > { %2191 = vmatprep.subr.bf16.mxu0 %v2487_v0 }
 0x273   : > { %2162 = vmatpush3.bf16.xpose.msra.mxu1 %v775_v44  ;;  %v1083_v44 = vsel %vm940_vm3, %v844_v38, 0 }
 0x274   : > { %2167 = vmatprep.subr.bf16.mxu1 %v2487_v0 }
 0x27a   : > { %2164 = vmatmul.mubr.msk.bf16.vlgmr.msra.gmra.mrb[4].mxu1 %vm514_vm1, %v611_v41  ;;  %v847_v41 = vld [vmem:[%s2997_s2 + $0x18] sm:$0xf] }
 0x27b   : > { %2169 = vmatprep.mubr.msk.bf16.mxu1 %vm2488_vm0, %v2487_v0  ;;  %2168 = vmatpush3.bf16.xpose.msra.mxu1 %v945_v47  ;;  %v1221_v46 = vsel %vm940_vm3, %v847_v41, 0 }
 0x27c   : > { %2173 = vmatprep.subr.bf16.mxu1 %v2487_v0 }
 0x33d   : > { %v676_v48 = vpop.f32.mrb[0].mxu1  ;;  %v744_v49 = vpop.f32.mrb[4].mxu0 }
 0x33e   : > { %v677_v51 = vadd.f32 %v2032_v45, %v676_v48  ;;  %v2149_v52 = vpop.f32.mrb[1].mxu1  ;;  %v2157_v53 = vpop.f32.mrb[5].mxu0  ;;  %v745_v62 = vadd.f32 %v2036_v61, %v744_v49  ;;  %v846_v48 = vld [vmem:[%s2997_s2 + $0x14] sm:$0xf] }
 0x33f   : > { %v679_v55 = vpop.f32.mrb[2].mxu1  ;;  %v747_v56 = vpop.f32.mrb[6].mxu0  ;;  %v1175_v53 = vsel %vm940_vm3, %v846_v48, 0 }
 0x340   : > { %v682_v57 = vmul.f32 0.35355338, %v677_v51  ;;  %v2150_v58 = vpop.f32.mrb[3].mxu1  ;;  %v2158_v59 = vpop.f32.mrb[7].mxu0  ;;  %v2759_v63 = vpack.c.bf16 %v745_v62, %v745_v62 }
 0x341   : > { %v848_v58 = vld [vmem:[%s2997_s2 + $0x1c] sm:$0xf] }
 0x342   : > { %v2748_v60 = vpack.c.bf16 %v682_v57, %v682_v57  ;;  %v1364_v57 = vsel %vm940_vm3, %v2759_v63, 0  ;;  %v1267_v62 = vsel %vm940_vm3, %v848_v58, 0 }
 0x344   : > { %825 = vrot.lane.b32.xlu0 %v2748_v60, %s2489_s28  ;;  %821 = vrot.lane.b32.xlu1 %v2748_v60, %s2490_s24  ;;  %v855_v22 = vrot.slane %v2748_v60, %v854_v12 }
 0x348   : > { %823 = vrot.lane.b32.xlu1 %v2748_v60, %s2491_s22 }
 0x34c   : > { %828 = vrot.lane.b32.xlu1 %v2759_v63, %s2490_s24 }
 0x34d   : > { %v2763_v1 = vpop.f32.mrb[4].mxu1 }
 0x34e   : > { %v2165_v2 = vpop.f32.mrb[5].mxu1 }
 0x34f   : > { %v814_v3 = vpop.f32.mrb[6].mxu1 }
 0x350   : > { %v2166_v4 = vpop.f32.mrb[7].mxu1  ;;  %830 = vrot.lane.b32.xlu1 %v2759_v63, %s2491_s22 }
 0x354   : > { %832 = vrot.lane.b32.xlu1 %v2759_v63, %s2489_s28  ;;  %v2040_v63 = vld [vmem:[%s3005_s10] ss:$0 sm:$0xff] }
 0x355   : > { %v812_v3 = vadd.f32 %v2040_v63, %v2763_v1 }
 0x357   : > { %v2843_v7 = vpack.c.bf16 %v812_v3, %v812_v3 }
 0x3b6   : > { %v2769_v13 = vpop.permute.xlu0 %825  ;;  %v2771_v15 = vpop.permute.xlu1 %821 }
 0x3b7   : > { %v897_v16 = vrot.slane %v2769_v13, %v854_v12  ;;  %v889_v17 = vrot.slane %v2771_v15, %v854_v12 }
 0x3b9   : > { %v898_v19 = vcombine.low %v889_v17, %v897_v16  ;;  %v899_v36 = vcombine.high %v889_v17, %v897_v16 }
 0x3ba   : > { %v2775_v20 = vpop.permute.xlu1 %823 }
 0x3bb   : > { %v863_v21 = vrot.slane %v2775_v20, %v854_v12  ;;  %v906_v23 = vrot.slane %v898_v19, %v871_v18  ;;  %v913_v42 = vrot.slane %v899_v36, %v871_v18 }
 0x3bd   : > { %v864_v24 = vcombine.low %v855_v22, %v863_v21  ;;  %v914_v29 = vcombine.high %v906_v23, %v2494_v28  ;;  %v865_v33 = vcombine.high %v855_v22, %v863_v21  ;;  %v920_v39 = vshrl.u32 %v906_v23, 16 }
 0x3be   : > { %v915_v51 = vcombine.high %v913_v42, %v2494_v28  ;;  %v829_v55 = vpop.permute.xlu1 %828  ;;  %v932_v59 = vshrl.u32 %v913_v42, 16 }
 0x3bf   : > { %v872_v26 = vrot.slane %v864_v24, %v871_v18  ;;  %v879_v40 = vrot.slane %v865_v33, %v871_v18  ;;  %v926_v49 = vshrl.u32 %v914_v29, 16  ;;  %v1425_v1 = vsel %vm940_vm3, %v829_v55, 0 }
 0x3c0   : > { %v938_v6 = vshrl.u32 %v915_v51, 16 }
 0x3c1   : > { %v880_v30 = vcombine.high %v872_v26, %v2494_v28  ;;  %v918_v31 = vpack.i.b16 %v906_v23, %v872_v26  ;;  %v919_v37 = vshrl.u32 %v872_v26, 16  ;;  %v930_v45 = vpack.i.b16 %v913_v42, %v879_v40 }
 0x3c2   : > { %v881_v50 = vcombine.high %v879_v40, %v2494_v28  ;;  %v931_v56 = vshrl.u32 %v879_v40, 16  ;;  %v831_v2 = vpop.permute.xlu1 %830 }
 0x3c3   : > { %2170 = vmatmul.mubr.msk.bf16.vlgmr.msra.gmra.mrb[8].mxu1 %vm940_vm3, %v918_v31  ;;  %v924_v34 = vpack.i.b16 %v914_v29, %v880_v30  ;;  %v921_v43 = vpack.i.b16 %v920_v39, %v919_v37  ;;  %v925_v47 = vshrl.u32 %v880_v30, 16  ;;  %v1486_v5 = vsel %vm940_vm3, %v831_v2, 0 }
 0x3c4   : > { %2174 = vmatpush3.bf16.xpose.msra.mxu1 %v991_v32  ;;  %2175 = vmatprep.mubr.msk.bf16.mxu1 %vm2488_vm0, %v2487_v0  ;;  %v936_v54 = vpack.i.b16 %v915_v51, %v881_v50  ;;  %v933_v61 = vpack.i.b16 %v932_v59, %v931_v56  ;;  %v937_v4 = vshrl.u32 %v881_v50, 16 }
 0x3c5   : > { %2182 = vmatmul.mubr.msk.bf16.vlgmr.msra.gmra.mrb[8].mxu0 %vm940_vm3, %v924_v34  ;;  %2185 = vmatprep.subr.bf16.mxu1 %v2487_v0  ;;  %v927_v52 = vpack.i.b16 %v926_v49, %v925_v47 }
 0x3c6   : > { %2192 = vmatpush3.bf16.xpose.msra.mxu0 %v1129_v35  ;;  %2193 = vmatprep.mubr.msk.bf16.mxu0 %vm2488_vm0, %v2487_v0  ;;  %v939_v8 = vpack.i.b16 %v938_v6, %v937_v4  ;;  %v833_v9 = vpop.permute.xlu1 %832 }
 0x3c7   : > { %2203 = vmatprep.subr.bf16.mxu0 %v2487_v0  ;;  %v1547_v10 = vsel %vm940_vm3, %v833_v9, 0 }
 0x3cb   : > { %2176 = vmatmul.mubr.msk.bf16.vlgmr.msra.gmra.mrb[12].mxu1 %vm940_vm3, %v921_v43 }
 0x3cc   : > { %2186 = vmatpush3.bf16.xpose.msra.mxu1 %v1083_v44  ;;  %2187 = vmatprep.mubr.msk.bf16.mxu1 %vm2488_vm0, %v2487_v0 }
 0x3cd   : > { %2194 = vmatmul.mubr.msk.bf16.vlgmr.msra.gmra.mrb[12].mxu0 %vm940_vm3, %v930_v45  ;;  %2197 = vmatprep.subr.bf16.mxu1 %v2487_v0 }
 0x3ce   : > { %2204 = vmatpush3.bf16.xpose.msra.mxu0 %v1221_v46  ;;  %2205 = vmatprep.mubr.msk.bf16.mxu0 %vm2488_vm0, %v2487_v0 }
 0x3cf   : > { %2215 = vmatprep.subr.bf16.mxu0 %v2487_v0 }
 0x3d3   : > { %2188 = vmatmul.mubr.msk.bf16.vlgmr.msra.gmra.mrb[16].mxu1 %vm940_vm3, %v927_v52 }
 0x3d4   : > { %2198 = vmatpush3.bf16.xpose.msra.mxu1 %v1175_v53  ;;  %2199 = vmatprep.mubr.msk.bf16.mxu1 %vm2488_vm0, %v2487_v0 }
 0x3d5   : > { %2206 = vmatmul.mubr.msk.bf16.vlgmr.msra.gmra.mrb[16].mxu0 %vm940_vm3, %v936_v54  ;;  %2209 = vmatprep.subr.bf16.mxu1 %v2487_v0 }
 0x3d6   : > { %2216 = vmatpush3.bf16.xpose.msra.mxu0 %v1364_v57  ;;  %2217 = vmatprep.mubr.msk.bf16.mxu0 %vm2488_vm0, %v2487_v0 }
 0x3d7   : > { %2227 = vmatprep.subr.bf16.mxu0 %v2487_v0 }
 0x3db   : > { %2200 = vmatmul.mubr.msk.bf16.vlgmr.msra.gmra.mrb[20].mxu1 %vm940_vm3, %v933_v61 }
 0x3dc   : > { %2210 = vmatpush3.bf16.xpose.msra.mxu1 %v1267_v62  ;;  %2211 = vmatprep.mubr.msk.bf16.mxu1 %vm2488_vm0, %v2487_v0 }
 0x3dd   : > { %2218 = vmatmul.mubr.msk.bf16.vlgmr.msra.gmra.mrb[20].mxu0 %vm940_vm3, %v2748_v60  ;;  %2221 = vmatprep.subr.bf16.mxu1 %v2487_v0  ;;  %v1642_v60 = vsel %vm1640_vm4, %v2843_v7, 0 }
 0x3de   : > { %2228 = vmatpush3.bf16.xpose.msra.mxu0 %v1486_v5  ;;  %2229 = vmatprep.mubr.msk.bf16.mxu0 %vm2488_vm0, %v2487_v0 }
 0x3df   : > { %2239 = vmatprep.subr.bf16.mxu0 %v2487_v0 }
 0x3e3   : > { %2212 = vmatmul.mubr.msk.bf16.vlgmr.msra.gmra.mrb[24].mxu1 %vm940_vm3, %v939_v8 }
 0x3e4   : > { %2222 = vmatpush3.bf16.xpose.msra.mxu1 %v1425_v1  ;;  %2223 = vmatprep.mubr.msk.bf16.mxu1 %vm2488_vm0, %v2487_v0 }
 0x3e5   : > { %2230 = vmatmul.mubr.msk.bf16.vlgmr.msra.gmra.mrb[24].mxu0 %vm940_vm3, %v2775_v20  ;;  %2233 = vmatprep.subr.bf16.mxu1 %v2487_v0 }
 0x3e6   : > { %2240 = vmatpush3.bf16.msra.mxu0 %v1642_v60  ;;  %2241 = vmatprep.mubr.msk.bf16.mxu0 %vm2488_vm0, %v2487_v0 }
 0x3e7   : > { %2251 = vmatprep.subr.bf16.mxu0 %v2487_v0 }
 0x3eb   : > { %2224 = vmatmul.mubr.msk.bf16.vlgmr.msra.gmra.mrb[28].mxu1 %vm940_vm3, %v2771_v15 }
 0x3ec   : > { %2234 = vmatpush3.bf16.xpose.msra.mxu1 %v1547_v10  ;;  %2235 = vmatprep.mubr.msk.bf16.mxu1 %vm2488_vm0, %v2487_v0 }
 0x3ed   : > { %2245 = vmatprep.subr.bf16.mxu1 %v2487_v0 }
 0x3f3   : > { %2236 = vmatmul.mubr.msk.bf16.vlgmr.msra.gmra.mrb[32].mxu1 %vm940_vm3, %v2769_v13 }
 0x3f4   : > { %2247 = vmatprep.mubr.msk.bf16.mxu1 %vm2488_vm0, %v2487_v0 }
 0x496   : > { %v981_v11 = vpop.f32.mrb[8].mxu1 }
 0x497   : > { %v2171_v12 = vpop.f32.mrb[9].mxu1  ;;  %v1317_v20 = vrot.slane %v981_v11, 1  ;;  %v1325_v21 = vrot.slane %v981_v11, 2  ;;  %v1333_v32 = vrot.slane %v981_v11, 3 }
 0x498   : > { %v984_v14 = vpop.f32.mrb[10].mxu1  ;;  %v1073_v16 = vpop.f32.mrb[8].mxu0 }
 0x499   : > { %v2172_v17 = vpop.f32.mrb[11].mxu1  ;;  %v2183_v18 = vpop.f32.mrb[9].mxu0  ;;  %v2054_v22 = vrot.slane %v1073_v16, 7  ;;  %v1344_v28 = vrot.slane %v1073_v16, 6  ;;  %v2068_v37 = vrot.slane %v1073_v16, 9 }
 0x49a   : > { %v1076_v19 = vpop.f32.mrb[10].mxu0 }
 0x49b   : > { %v2184_v15 = vpop.f32.mrb[11].mxu0 }
 0x49e   : > { %v1027_v23 = vpop.f32.mrb[12].mxu1 }
 0x49f   : > { %v1341_v24 = vrot.slane %v1027_v23, 7  ;;  %v1407_v13 = vsel %vm1342_vm5, %v1027_v23, %v1317_v20  ;;  %v2060_v25 = vrot.slane %v1027_v23, 9  ;;  %v2067_v26 = vrot.slane %v1027_v23, 10  ;;  %v2177_v27 = vpop.f32.mrb[13].mxu1 }
 0x4a0   : > { %v1409_v29 = vsel %vm1345_vm6, %v2054_v22, %v1407_v13  ;;  %v1030_v30 = vpop.f32.mrb[14].mxu1  ;;  %v1165_v31 = vpop.f32.mrb[12].mxu0 }
 0x4a1   : > { %v1343_v33 = vsel %vm1342_vm5, %v1341_v24, %v981_v11  ;;  %v1468_v34 = vsel %vm1342_vm5, %v2060_v25, %v1325_v21  ;;  %v2178_v35 = vpop.f32.mrb[15].mxu1  ;;  %v2195_v36 = vpop.f32.mrb[13].mxu0  ;;  %v1529_v42 = vsel %vm1342_vm5, %v2067_v26, %v1333_v32  ;;  %v2070_v44 = vrot.slane %v1165_v31, 7 }
 0x4a2   : > { %v1168_v38 = vpop.f32.mrb[14].mxu0  ;;  %v1346_v39 = vsel %vm1345_vm6, %v1344_v28, %v1343_v33  ;;  %v1470_v40 = vsel %vm1345_vm6, %v1073_v16, %v1468_v34  ;;  %v1531_v43 = vsel %vm1345_vm6, %v2068_v37, %v1529_v42  ;;  %v1350_v51 = vrot.slane %v1165_v31, 4 }
 0x4a3   : > { %v2196_v41 = vpop.f32.mrb[15].mxu0  ;;  %v2063_v52 = vrot.slane %v1165_v31, 6  ;;  %v2056_v56 = vrot.slane %v1165_v31, 5 }
 0x4a6   : > { %v1119_v45 = vpop.f32.mrb[16].mxu1 }
 0x4a7   : > { %v1347_v46 = vrot.slane %v1119_v45, 5  ;;  %v2055_v47 = vrot.slane %v1119_v45, 6  ;;  %v2062_v48 = vrot.slane %v1119_v45, 7  ;;  %v1533_v49 = vsel %vm1348_vm7, %v1119_v45, %v1531_v43  ;;  %v2189_v50 = vpop.f32.mrb[17].mxu1 }
 0x4a8   : > { %v1535_v53 = vsel %vm1351_vm8, %v2070_v44, %v1533_v49  ;;  %v1122_v54 = vpop.f32.mrb[18].mxu1  ;;  %v1257_v55 = vpop.f32.mrb[16].mxu0 }
 0x4a9   : > { %v1349_v57 = vsel %vm1348_vm7, %v1347_v46, %v1346_v39  ;;  %v1411_v58 = vsel %vm1348_vm7, %v2055_v47, %v1409_v29  ;;  %v1472_v59 = vsel %vm1348_vm7, %v2062_v48, %v1470_v40  ;;  %v2190_v61 = vpop.f32.mrb[19].mxu1  ;;  %v2207_v62 = vpop.f32.mrb[17].mxu0  ;;  %v1331_v6 = vrot.slane %v1257_v55, 2 }
 0x4aa   : > { %v1260_v63 = vpop.f32.mrb[18].mxu0  ;;  %v1474_v2 = vsel %vm1351_vm8, %v2063_v52, %v1472_v59  ;;  %v1352_v3 = vsel %vm1351_vm8, %v1350_v51, %v1349_v57  ;;  %v1413_v5 = vsel %vm1351_vm8, %v2056_v56, %v1411_v58  ;;  %v2058_v11 = vrot.slane %v1257_v55, 3 }
 0x4ab   : > { %v2208_v4 = vpop.f32.mrb[19].mxu0  ;;  %v1477_v12 = vrot.slane %v1331_v6, 2  ;;  %v2071_v22 = vrot.slane %v1257_v55, 5 }
 0x4ae   : > { %v1211_v8 = vpop.f32.mrb[20].mxu1 }
 0x4af   : > { %v1338_v1 = vrot.slane %v1211_v8, 3  ;;  %v2057_v60 = vrot.slane %v1211_v8, 4  ;;  %v2064_v9 = vrot.slane %v1211_v8, 5  ;;  %v2201_v10 = vpop.f32.mrb[21].mxu1 }
 0x4b0   : > { %v1214_v14 = vpop.f32.mrb[22].mxu1  ;;  %v1400_v16 = vpop.f32.mrb[20].mxu0 }
 0x4b1   : > { %v1536_v17 = vrot.slane %v1338_v1, 3  ;;  %v2202_v18 = vpop.f32.mrb[23].mxu1  ;;  %v2219_v19 = vpop.f32.mrb[21].mxu0  ;;  %v1476_v15 = vsel %vm1353_vm9, %v2064_v9, %v1474_v2  ;;  %v1354_v20 = vsel %vm1353_vm9, %v1338_v1, %v1352_v3  ;;  %v1415_v21 = vsel %vm1353_vm9, %v2057_v60, %v1413_v5 }
 0x4b2   : > { %v1403_v23 = vpop.f32.mrb[22].mxu0  ;;  %v1478_v24 = vsel %vm1355_vm10, %v1477_v12, %v1476_v15  ;;  %v1356_v13 = vsel %vm1355_vm10, %v1331_v6, %v1354_v20  ;;  %v1417_v25 = vsel %vm1355_vm10, %v2058_v11, %v1415_v21 }
 0x4b3   : > { %v2220_v26 = vpop.f32.mrb[23].mxu0  ;;  %v1537_v27 = vsel %vm1353_vm9, %v1536_v17, %v1535_v53 }
 0x4b4   : > { %v1539_v28 = vsel %vm1355_vm10, %v2071_v22, %v1537_v27 }
 0x4b6   : > { %v1303_v29 = vpop.f32.mrb[24].mxu1 }
 0x4b7   : > { %v1324_v30 = vrot.slane %v1303_v29, 1  ;;  %v2065_v31 = vrot.slane %v1303_v29, 3  ;;  %v2072_v32 = vrot.slane %v1303_v29, 4  ;;  %v2213_v33 = vpop.f32.mrb[25].mxu1 }
 0x4b8   : > { %v1306_v34 = vpop.f32.mrb[26].mxu1  ;;  %v1522_v35 = vpop.f32.mrb[24].mxu0 }
 0x4b9   : > { %v1418_v36 = vrot.slane %v1324_v30, 1  ;;  %v1480_v37 = vsel %vm1357_vm11, %v2065_v31, %v1478_v24  ;;  %v2214_v38 = vpop.f32.mrb[27].mxu1  ;;  %v2231_v39 = vpop.f32.mrb[25].mxu0  ;;  %v1358_v40 = vsel %vm1357_vm11, %v1324_v30, %v1356_v13  ;;  %v1541_v41 = vsel %vm1357_vm11, %v2072_v32, %v1539_v28 }
 0x4ba   : > { %v1523_v42 = vadd.f32 %v1522_v35, %v1480_v37  ;;  %v1525_v43 = vpop.f32.mrb[26].mxu0  ;;  %v1401_v44 = vadd.f32 %v1400_v16, %v1358_v40  ;;  %v2354_v40 = vld [vmem:[%s3006_s11] sm:$0xff]  }
 0x4bb   : > { %v2232_v45 = vpop.f32.mrb[27].mxu0  ;;  %v1419_v46 = vsel %vm1357_vm11, %v1418_v36, %v1417_v25 }
 0x4bc   : > { %v1589_v47 = vsel %vm940_vm3, %v1401_v44, -inf  ;;  %v1595_v52 = vsel %vm940_vm3, %v1523_v42, -inf }
 0x4bd   : > { %1590 = vmax.xlane.f32.xlu1 %v1589_v47 }
 0x4be   : > { %v1461_v48 = vpop.f32.mrb[28].mxu1 }
 0x4bf   : > { %v1462_v49 = vadd.f32 %v1461_v48, %v1419_v46  ;;  %v2225_v50 = vpop.f32.mrb[29].mxu1 }
 0x4c0   : > { %v1464_v51 = vpop.f32.mrb[30].mxu1 }
 0x4c1   : > { %1596 = vmax.xlane.f32.xlu1 %v1595_v52  ;;  %v2226_v53 = vpop.f32.mrb[31].mxu1  ;;  %v1592_v54 = vsel %vm940_vm3, %v1462_v49, -inf }
 0x4c2   : > { %1593 = vmax.xlane.f32.xlu0 %v1592_v54 }
 0x4c6   : > { %v1583_v55 = vpop.f32.mrb[32].mxu1 }
 0x4c7   : > { %v1584_v56 = vadd.f32 %v1583_v55, %v1541_v41  ;;  %v2237_v57 = vpop.f32.mrb[33].mxu1  ;;  %v1864_v41 = vsel %vm514_vm1, %v2354_v40, 0 }
 0x4c8   : > { %v1586_v58 = vpop.f32.mrb[34].mxu1 }
 0x4c9   : > { %v2238_v59 = vpop.f32.mrb[35].mxu1  ;;  %v1598_v61 = vsel %vm940_vm3, %v1584_v56, -inf }
 0x4ca   : > { %1599 = vmax.xlane.f32.xlu1 %v1598_v61 }
 0x4db   : > { %837 = vrot.lane.b32.xlu1 %v2843_v7, %s2491_s22  ;;  %s500_s22 = scalar_lea.vmem [#allocation6], %s2026_s20 }
 0x4dc   : > { %s1932_s21 = sshll.u32 %s500_s22, 4  ;;  %s2949_s21 = int_to_ptr.vmem [resolvable:$true] %s1932_s21 }
 0x4dd   : > { %s2402_s20 = scalar_lea.vmem %s2949_s21, 128  ;;  %p2409_p1 = scmp.lt.s32.totalorder %s2949_s21, %s2407_s17 }
 0x4de   : > { %p2403_p8 = scmp.ne.s32.totalorder %s2949_s21, %s2402_s20  ;;  %p2410_p3 = scmp.lt.s32.totalorder %s2408_s29, %s2402_s20 }
 0x4e0   : > { %p2404_p11 = pnand %p2403_p8, %p3032_p10  ;;  %p2411_p5 = por %p2410_p3, %p2409_p1 }
 0x4e2   : > { %p2405_p13 = pneg %p2404_p11 }
 0x4e4   : > { %p2412_p6 = pnand %p2411_p5, %p2405_p13 }
 0x54a   : > { %v1591_v62 = vpop.xlane.xlu1 %1590 }
 0x54b   : > { %v1601_v63 = vsub.f32 %v1401_v44, %v1591_v62 }
 0x54d   : > { %v1605_v2 = vmul.f32 1.442695, %v1601_v63 }
 0x54e   : > { %v1597_v3 = vpop.xlane.xlu1 %1596 }
 0x54f   : > { %2358 = vpow2.f32 %v1605_v2  ;;  %v1603_v4 = vsub.f32 %v1523_v42, %v1597_v3  ;;  %v1594_v5 = vpop.xlane.xlu0 %1593  ;;  %v2355_v42 = vld [vmem:[%s3006_s11 + $0x8] sm:$0xff]  }
 0x550   : > { %v1602_v6 = vsub.f32 %v1462_v49, %v1594_v5  ;;  %v1867_v43 = vsel %vm514_vm1, %v2355_v42, 0  ;;  %v2078_v5 = vld [vmem:[%s3007_s12] ss:$0 sm:$0xff] }
 0x551   : > { %v1609_v8 = vmul.f32 1.442695, %v1603_v4 }
 0x552   : > { %v1607_v1 = vmul.f32 1.442695, %v1602_v6 }
 0x553   : > { %2360 = vpow2.f32 %v1609_v8  ;;  %v2082_v8 = vld [vmem:[%s3008_s13] ss:$0 sm:$0xff] }
 0x554   : > { %2362 = vpow2.f32 %v1607_v1 }
 0x557   : > { %v1600_v60 = vpop.xlane.xlu1 %1599 }
 0x558   : > { %v1604_v9 = vsub.f32 %v1584_v56, %v1600_v60 }
 0x559   : > { %v2359_v10 = vpop.eup %2358 }
 0x55a   : > { %v1611_v11 = vmul.f32 1.442695, %v1604_v9  ;;  %v1613_v12 = vsel %vm940_vm3, %v2359_v10, 0.0 }
 0x55b   : > { %1614 = vadd.xlane.f32.xlu0 %v1613_v12  ;;  %v838_v21 = vpop.permute.xlu1 %837 }
 0x55c   : > { %2364 = vpow2.f32 %v1611_v11  ;;  %v1734_v30 = vsel %vm1640_vm4, %v838_v21, 0 }
 0x55d   : > { %v2361_v14 = vpop.eup %2360 }
 0x55e   : > { %v2363_v16 = vpop.eup %2362  ;;  %v1619_v17 = vsel %vm940_vm3, %v2361_v14, 0.0 }
 0x55f   : > { %1620 = vadd.xlane.f32.xlu0 %v1619_v17  ;;  %v1616_v18 = vsel %vm940_vm3, %v2363_v16, 0.0 }
 0x560   : > { %1617 = vadd.xlane.f32.xlu1 %v1616_v18 }
 0x566   : > { %v2365_v19 = vpop.eup %2364 }
 0x567   : > { %v1622_v15 = vsel %vm940_vm3, %v2365_v19, 0.0 }
 0x568   : > { %1623 = vadd.xlane.f32.xlu1 %v1622_v15 }
 0x575   : > { %835 = vrot.lane.b32.xlu0 %v2843_v7, %s2490_s24  ;;  %s2084_s24 = sshll.u32 %s2476_s16, 7  ;;  %s1919_s16 = scalar_lea.sflag [#allocation5], %s498_s19 }
 0x579   : > { %839 = vrot.lane.b32.xlu1 %v2843_v7, %s2489_s28 }
 0x5e8   : > { %v1615_v20 = vpop.xlane.xlu0 %1614 }
 0x5e9   : > { %2366 = vrcp.f32 %v1615_v20 }
 0x5ec   : > { %v1621_v22 = vpop.xlane.xlu0 %1620 }
 0x5ed   : > { %2368 = vrcp.f32 %v1621_v22  ;;  %v1618_v23 = vpop.xlane.xlu1 %1617 }
 0x5ee   : > { %2370 = vrcp.f32 %v1618_v23 }
 0x5f0   : > { %v836_v24 = vpop.permute.xlu0 %835 }
 0x5f1   : > { %v1688_v13 = vsel %vm1640_vm4, %v836_v24, 0 }
 0x5f2   : > { %2246 = vmatpush3.bf16.msra.mxu1 %v1688_v13 }
 0x5f3   : > { %v2367_v25 = vpop.eup %2366  ;;  %2257 = vmatprep.subr.bf16.mxu1 %v2487_v0 }
 0x5f4   : > { %v1629_v26 = vmul.f32 %v2367_v25, %v2359_v10 }
 0x5f5   : > { %v1624_v27 = vpop.xlane.xlu1 %1623 }
 0x5f6   : > { %2372 = vrcp.f32 %v1624_v27  ;;  %v1633_v28 = vpack.c.bf16 %v1629_v26, %v1629_v26 }
 0x5f7   : > { %v2369_v29 = vpop.eup %2368 }
 0x5f8   : > { %v2371_v7 = vpop.eup %2370  ;;  %2242 = vmatmul.mubr.msk.bf16.vlgmr.msra.gmra.mrb[28].mxu0 %vm940_vm3, %v1633_v28  ;;  %v1631_v32 = vmul.f32 %v2369_v29, %v2361_v14 }
 0x5f9   : > { %v1630_v31 = vmul.f32 %v2371_v7, %v2363_v16  ;;  %2252 = vmatpush3.bf16.msra.mxu0 %v1734_v30  ;;  %2253 = vmatprep.mubr.msk.bf16.mxu0 %vm2488_vm0, %v2487_v0  ;;  %v840_v33 = vpop.permute.xlu1 %839 }
 0x5fa   : > { %2263 = vmatprep.subr.bf16.mxu0 %v2487_v0  ;;  %v1780_v35 = vsel %vm1640_vm4, %v840_v33, 0  ;;  %v1635_v36 = vpack.c.bf16 %v1631_v32, %v1631_v32 }
 0x5fb   : > { %v1634_v34 = vpack.c.bf16 %v1630_v31, %v1630_v31 }
 0x5fd   : > { %2248 = vmatmul.mubr.msk.bf16.vlgmr.msra.gmra.mrb[36].mxu1 %vm940_vm3, %v1634_v34 }
 0x5fe   : > { %2258 = vmatpush3.bf16.msra.mxu1 %v1780_v35  ;;  %2259 = vmatprep.mubr.msk.bf16.mxu1 %vm2488_vm0, %v2487_v0 }
 0x600   : > { %v2373_v37 = vpop.eup %2372  ;;  %2254 = vmatmul.mubr.msk.bf16.vlgmr.msra.gmra.mrb[32].mxu0 %vm940_vm3, %v1635_v36 }
 0x601   : > { %v1632_v38 = vmul.f32 %v2373_v37, %v2365_v19  ;;  %2267 = vmatprep.mubr.msk.bf16.mxu0 %vm2488_vm0, %v2487_v0 }
 0x602   : > { %2264 = vmatpush3.bf16.xpose.msra.mxu0 %v1864_v41 }
 0x603   : > { %v1636_v39 = vpack.c.bf16 %v1632_v38, %v1632_v38  ;;  %2265 = vmatprep.subr.bf16.mxu0 %v2487_v0 }
 0x605   : > { %2260 = vmatmul.mubr.msk.bf16.vlgmr.msra.gmra.mrb[40].mxu1 %vm940_vm3, %v1636_v39 }
 0x60a   : > { %2266 = vmatpush3.bf16.xpose.msra.mxu0 %v1867_v43 }
 0x6cb   : > { %v1678_v44 = vpop.f32.mrb[28].mxu0 }
 0x6cc   : > { %v2243_v45 = vpop.f32.mrb[29].mxu0 }
 0x6cd   : > { %v1681_v46 = vpop.f32.mrb[30].mxu0 }
 0x6ce   : > { %v2244_v47 = vpop.f32.mrb[31].mxu0 }
 0x6d0   : > { %v1724_v48 = vpop.f32.mrb[36].mxu1 }
 0x6d1   : > { %1823 = vrot.lane.b32.xlu0 %v1724_v48, %s2495_s25  ;;  %v2249_v49 = vpop.f32.mrb[37].mxu1 }
 0x6d2   : > { %v1727_v50 = vpop.f32.mrb[38].mxu1 }
 0x6d3   : > { %v2250_v51 = vpop.f32.mrb[39].mxu1  ;;  %v1770_v52 = vpop.f32.mrb[32].mxu0 }
 0x6d4   : > { %1827 = vrot.lane.b32.xlu1 %v1770_v52, %s2496_s26  ;;  %v2255_v0 = vpop.f32.mrb[33].mxu0 }
 0x6d5   : > { %v1773_v53 = vpop.f32.mrb[34].mxu0 }
 0x6d6   : > { %v2256_v54 = vpop.f32.mrb[35].mxu0 }
 0x6d8   : > { %v1816_v55 = vpop.f32.mrb[40].mxu1 }
 0x6d9   : > { %1831 = vrot.lane.b32.xlu0 %v1816_v55, %s2497_s27  ;;  %v2261_v56 = vpop.f32.mrb[41].mxu1  ;;  %s2947_s27 = scalar_lea.hbm %s3009_s14, %s2084_s24 }
 0x6da   : > { %v1819_v57 = vpop.f32.mrb[42].mxu1 }
 0x6db   : > { %v2262_v58 = vpop.f32.mrb[43].mxu1 }
 0x743   : > { %v1824_v59 = vpop.permute.xlu0 %1823 }
 0x744   : > { %v1834_v62 = vsel %vm940_vm3, %v1678_v44, %v1824_v59 }
 0x746   : > { %v1828_v61 = vpop.permute.xlu1 %1827 }
 0x747   : > { %v1835_v63 = vsel %vm524_vm2, %v1834_v62, %v1828_v61 }
 0x74b   : > { %v1832_v2 = vpop.permute.xlu0 %1831 }
 0x74c   : > { %v1837_v3 = vsel %vm1836_vm12, %v1835_v63, %v1832_v2 }
 0x74d   : > { %v1838_v4 = vpack.c.bf16 %v1837_v3, %v1837_v3 }
 0x74f   : > { %2268 = vmatmul.mubr.msk.bf16.vlgmr.msra.gmra.mrb[36].mxu0 %vm514_vm1, %v1838_v4 }
 0x822   : > { %v1903_v6 = vpop.f32.mrb[36].mxu0 }
 0x823   : > { %v1904_v1 = vadd.f32 %v2078_v5, %v1903_v6  ;;  %v2269_v60 = vpop.f32.mrb[37].mxu0 }
 0x824   : > { %v1906_v9 = vpop.f32.mrb[38].mxu0 }
 0x825   : > { %v1916_v10 = vmul.f32 %v2082_v8, %v1904_v1  ;;  %v2270_v11 = vpop.f32.mrb[39].mxu0 }
 0x827   : > { %1917 = vst.msk [vmem:[%s500_s22] sm:$0xff] %vm514_vm1, %v1916_v10 }
 0x828   : > { %2415 = shalt.err (!%p2412_p6)
}
 0x829   : > { %s2416_s19 = scalar_lea.hbm %s2947_s27, 128  ;;  %s2420_s22 = scalar_lea.hbm %s3009_s14, 256 }
 0x82a   : > { %p2417_p7 = scmp.ne.s32.totalorder %s2947_s27, %s2416_s19  ;;  %p2421_p0 = scmp.lt.u32.totalorder %s2947_s27, %s3009_s14 }
 0x82b   : > { %p2422_p2 = scmp.lt.u32.totalorder %s2420_s22, %s2416_s19  ;;  %p2424_p8 = scmp.lt.u32.totalorder %s2416_s19, %s2947_s27 }
 0x82c   : > { %p2418_p9 = pnand %p2417_p7, %p3032_p10 }
 0x82d   : > { %p2423_p4 = por %p2422_p2, %p2421_p0 }
 0x82e   : > { %p2419_p12 = pneg %p2418_p9 }
 0x82f   : > { %p2425_p11 = por %p2424_p8, %p2423_p4 }
 0x831   : > { %p2426_p13 = pnand %p2425_p11, %p2419_p12 }
 0x833   : > { %2429 = shalt.err (!%p2426_p13)
}
 0x834   : > { %2275 = dma.vmem_to_hbm [thread:$0]  (%p3032_p10), %s2949_s21, 128, %s2947_s27, %s1919_s16  }
 0x835 PF: > { %s3033_s20 = sld [smem:[#allocation9_spill]]  ;;  %s3034_s15 = sld [smem:[#allocation13_spill]] }
 0x836   : > { %p2287_p1 = scmp.ge.s32.totalorder %s2484_s18, 2 }
 0x83b   : > { %s1944_s17 = sand.u32 1, %s3033_s20   ;;  %p3035_p3 = scmp.ne.s32.totalorder %s3034_s15, 0 }
 0x83c   : > { %s1945_s29 = scalar_lea.sflag [#allocation5], %s1944_s17 }
 0x83d   : > { %p2282_p5 = pnand %p2287_p1, %p3035_p3 }
 0x83f   : > { %2459 = dma.done.wait (!%p2282_p5), %s1945_s29, 128  }
 0x840   : > { %2461 = vsyncadd (!%p2282_p5), %s1945_s29, 4294967168  ;;  %s28_s18 = sadd.s32 1, %s2484_s18   ;;  %s3036_s19 = sld [smem:[#allocation10_spill]] }
 0x841   : > { %p25_p6 = scmp.ge.s32.totalorder %s28_s18, 4   ;;  %s3037_s15 = sld [smem:[#allocation14_spill]] }
 0x842   : > { %s3038_s16 = sld [smem:[#allocation11_spill]]  ;;  %s3039_s17 = sld [smem:[#allocation12_spill]] }
 0x843   : > { %s3040_s29 = smov %s2468_s30  ;;  %27 = sbr.rel (!%p25_p6) target bundleno = 5 (0x5), region = 125 }
 0x846   : > { %s3041_s30 = smov %s3036_s19 }
 0x84a   :  { %1950 = vsyncpa [#allocation4], 1 }
 0x84b   :  { %1952 = vsyncpa [#allocation4 + $0x1], 1 }
 0x84c   :  { %1953 = vsyncpa [#allocation5], 1 }
 0x84d   :  { %1955 = vsyncpa [#allocation5 + $0x1], 1 }

</bundles_post_ra>
